<compile_context>
chip_gen: v7x
topology: tpu7x:2x2x1
jax: 0.10.0
libtpu: 0.0.40
codegen_flags: <defaults>
</compile_context>

<pallas_src>
import jax
import jax.numpy as jnp
from jax.experimental import pallas as pl
from jax.experimental.pallas import tpu as pltpu

# ---------------- configuration (small synthetic CLIP-ViT) ----------------
B = 2                 # batch
C_IN = 3              # image channels
IMG = 16              # H = W
PATCH = 8             # conv1 kernel == stride (patchify)
GRID_SIDE = IMG // PATCH
N_PATCH = GRID_SIDE * GRID_SIDE
WIDTH = 32            # transformer width (stand-in for 768)
HEADS = 4
HEAD_DIM = WIDTH // HEADS
LAYERS = 2            # number of visual transformer resblocks
MLP_DIM = 4 * WIDTH
PROMPT_NUM = 2        # args.prompt_num
INJECTION_LAYER = 1   # args.injection_layer (< LAYERS)
EMBED = 16            # image_encoder.proj output dim
N_CLASSES = 3
LN_EPS = 1e-5
DTYPE = jnp.float32   # original casts to clip_model.dtype (fp32 on cpu/mps)

S0 = N_PATCH + 1                    # cls + patch tokens
S_FULL = S0 + PROMPT_NUM            # after deep-prompt injection
S_PAD = ((S_FULL + 7) // 8) * 8     # sequence padded to a sublane multiple
PATCH_DIM = C_IN * PATCH * PATCH

VMEM = pltpu.MemorySpace.VMEM
SMEM = pltpu.MemorySpace.SMEM


# ------------------------------ fused kernel -------------------------------
def _ln(x, g, b):
    """LayerNorm along the last (feature) axis, f32 math."""
    mu = jnp.mean(x, axis=-1, keepdims=True)
    xc = x - mu
    var = jnp.mean(xc * xc, axis=-1, keepdims=True)
    return xc * jax.lax.rsqrt(var + LN_EPS) * g + b


def _fused_forward_kernel(
        patches_ref, w_patch_ref, tok_bias_ref, ln_pre_g_ref, ln_pre_b_ref,
        ln1_g_ref, ln1_b_ref, wqkv_ref, bqkv_ref, wo_ref, bo_ref,
        ln2_g_ref, ln2_b_ref, w_fc_ref, b_fc_ref, w_proj_ref, b_proj_ref,
        prompt_keep_ref, prompt_fill_ref, ln_post_g_ref, ln_post_b_ref,
        proj_ref, txt_t_ref, scale_ref, out_ref):
    f32 = jnp.float32

    # --- patch embedding (conv1 as patchify @ W). cls/pad rows of `patches`
    # are zero, so their embedding is zero and the real values come from the
    # token_bias slab (cls embedding + positional embedding, pre-laid-out).
    tok = jnp.dot(patches_ref[...], w_patch_ref[...],
                  preferred_element_type=f32)                    # (B*S_PAD, D)
    tok = tok + tok_bias_ref[...]
    tok = _ln(tok, ln_pre_g_ref[...], ln_pre_b_ref[...])         # ln_pre

    # Additive key-padding biases, built ONCE (0 for live keys, -1e30 for pad).
    kpos = jax.lax.broadcasted_iota(jnp.int32, (1, 1, S_PAD), 2)
    kbias_pre = jnp.where(kpos < S0, 0.0, -1e30).astype(f32)     # before injection
    kbias_post = jnp.where(kpos < S_FULL, 0.0, -1e30).astype(f32)  # after injection

    for l in range(LAYERS):                                      # static unroll
        if l == INJECTION_LAYER:
            # deep-prompt injection: overwrite the (previously padded) prompt
            # slots with the prompt embeddings (same values across the batch).
            # keep==0 exactly at the prompt rows; fill holds the prompt values.
            tok = tok * prompt_keep_ref[...] + prompt_fill_ref[...]
        kbias = kbias_pre if l < INJECTION_LAYER else kbias_post

        # ---- attention: fused QKV projection + batched per-head attention ----
        # (1/sqrt(head_dim) is pre-folded into the Q columns of wqkv/bqkv.)
        h = _ln(tok, ln1_g_ref[l], ln1_b_ref[l])
        qkv = jnp.dot(h, wqkv_ref[l], preferred_element_type=f32) + bqkv_ref[l]
        heads = []
        for hh in range(HEADS):                                  # static unroll
            q = qkv[:, hh * HEAD_DIM:(hh + 1) * HEAD_DIM]
            k = qkv[:, WIDTH + hh * HEAD_DIM:WIDTH + (hh + 1) * HEAD_DIM]
            v = qkv[:, 2 * WIDTH + hh * HEAD_DIM:2 * WIDTH + (hh + 1) * HEAD_DIM]
            q = q.reshape(B, S_PAD, HEAD_DIM)
            k = k.reshape(B, S_PAD, HEAD_DIM)
            v = v.reshape(B, S_PAD, HEAD_DIM)
            s = jnp.einsum('bqd,bkd->bqk', q, k,
                           preferred_element_type=f32) + kbias
            s = s - jnp.max(s, axis=-1, keepdims=True)
            p = jnp.exp(s)
            p = p * pl.reciprocal(jnp.sum(p, axis=-1, keepdims=True), approx=True)
            ctx = jnp.einsum('bqk,bkd->bqd', p, v, preferred_element_type=f32)
            heads.append(ctx.reshape(B * S_PAD, HEAD_DIM))
        ctx_all = jnp.concatenate(heads, axis=-1)                # (B*S_PAD, D)
        tok = tok + (jnp.dot(ctx_all, wo_ref[l],
                             preferred_element_type=f32) + bo_ref[l])

        # ---- MLP: c_fc + QuickGELU + c_proj ----------------------------------
        h2 = _ln(tok, ln2_g_ref[l], ln2_b_ref[l])
        ff = jnp.dot(h2, w_fc_ref[l], preferred_element_type=f32) + b_fc_ref[l]
        ff = ff * (1.0 / (1.0 + jnp.exp(-1.702 * ff)))           # QuickGELU (CLIP)
        tok = tok + (jnp.dot(ff, w_proj_ref[l],
                             preferred_element_type=f32) + b_proj_ref[l])

    # ---- ln_post(cls token) @ proj, normalize, logit_scale * img @ text.T ----
    r = jax.lax.broadcasted_iota(jnp.int32, (B, B * S_PAD), 0)
    c = jax.lax.broadcasted_iota(jnp.int32, (B, B * S_PAD), 1)
    sel = (c == r * S_PAD).astype(f32)                           # row b*S_PAD = cls
    cls_tok = jnp.dot(sel, tok, preferred_element_type=f32)      # (B, D)
    cls_tok = _ln(cls_tok, ln_post_g_ref[...], ln_post_b_ref[...])
    img = jnp.dot(cls_tok, proj_ref[...], preferred_element_type=f32)   # (B, E)
    inv = jax.lax.rsqrt(jnp.sum(img * img, axis=-1, keepdims=True))
    sim = jnp.dot(img * inv, txt_t_ref[...], preferred_element_type=f32)
    out_ref[...] = (scale_ref[0, 0] * sim).astype(out_ref.dtype)


def _fused_forward(patches_padded, p):
    n_vmem = 23
    return pl.pallas_call(
        _fused_forward_kernel,
        out_shape=jax.ShapeDtypeStruct((B, N_CLASSES), DTYPE),
        in_specs=[pl.BlockSpec(memory_space=VMEM)] * n_vmem
                 + [pl.BlockSpec(memory_space=SMEM)],
        out_specs=pl.BlockSpec(memory_space=VMEM),
    )(
        patches_padded,
        p["w_patch"], p["token_bias"], p["ln_pre_g"], p["ln_pre_b"],
        p["ln1_g"], p["ln1_b"], p["wqkv"], p["bqkv"], p["wo"], p["bo"],
        p["ln2_g"], p["ln2_b"], p["w_fc"], p["b_fc"], p["w_proj"], p["b_proj"],
        p["prompt_keep"], p["prompt_fill"], p["ln_post_g"], p["ln_post_b"],
        p["proj"], p["text_features_t"],
        p["logit_scale"],
    )


# ------------------------------ forward ------------------------------------
def deep_prompt_clip_forward(images, params):
    """Equivalent of DeepPromptCLIP.forward (custom_encode_image + similarity)."""
    x = images.astype(DTYPE)                        # x.type(clip_model.dtype)
    bb = x.shape[0]
    # conv1 patchify (kernel == stride, no bias): layout glue only; the matmul
    # runs inside the fused kernel.  cls / pad token rows are zero-filled so a
    # single (B*S_PAD, PATCH_DIM) slab matches the padded token layout.
    patches = x.reshape(bb, C_IN, GRID_SIDE, PATCH, GRID_SIDE, PATCH)
    patches = patches.transpose(0, 2, 4, 1, 3, 5).reshape(bb, N_PATCH, PATCH_DIM)
    patches_padded = jnp.concatenate(
        [jnp.zeros((bb, 1, PATCH_DIM), DTYPE),            # cls slot
         patches,
         jnp.zeros((bb, S_PAD - S0, PATCH_DIM), DTYPE)],  # pad slots
        axis=1).reshape(bb * S_PAD, PATCH_DIM)
    return _fused_forward(patches_padded, params)


# --------------------------- parameter setup --------------------------------
def init_params(key):
    keys = jax.random.split(key, 8 + LAYERS)
    ks = iter(keys)

    def nrm(k, shape, scale=0.02):
        return (scale * jax.random.normal(k, shape, jnp.float32)).astype(DTYPE)

    p = {}
    conv1_w = nrm(next(ks), (WIDTH, C_IN, PATCH, PATCH))
    p["w_patch"] = conv1_w.reshape(WIDTH, PATCH_DIM).T               # (PATCH_DIM, D)

    class_embedding = nrm(next(ks), (1, WIDTH))
    positional_embedding = nrm(next(ks), (S0, WIDTH))
    # token_bias: class-embedding + positional-embedding pre-laid-out in the
    # padded (B*S_PAD, D) token layout (pad slots zero).  This folds the torch
    # cls-concat + positional-add into a single in-kernel add.
    bias_one = jnp.concatenate(
        [class_embedding + positional_embedding[0:1],
         positional_embedding[1:],
         jnp.zeros((S_PAD - S0, WIDTH), DTYPE)], axis=0)             # (S_PAD, D)
    p["token_bias"] = jnp.tile(bias_one, (B, 1))                     # (B*S_PAD, D)

    p["ln_pre_g"] = jnp.ones((1, WIDTH), DTYPE)
    p["ln_pre_b"] = jnp.zeros((1, WIDTH), DTYPE)

    attn_scale = 1.0 / float(HEAD_DIM) ** 0.5
    wqkv, bqkv, wo, bo = [], [], [], []
    w_fc, b_fc, w_proj, b_proj = [], [], [], []
    for _ in range(LAYERS):
        lk = jax.random.split(next(ks), 8)
        in_w = 0.02 * jax.random.normal(lk[0], (3 * WIDTH, WIDTH), jnp.float32)  # in_proj_weight
        in_b = 0.02 * jax.random.normal(lk[1], (3 * WIDTH,), jnp.float32)
        out_w = 0.02 * jax.random.normal(lk[2], (WIDTH, WIDTH), jnp.float32)     # out_proj.weight
        out_b = 0.02 * jax.random.normal(lk[3], (WIDTH,), jnp.float32)
        fc_w = 0.02 * jax.random.normal(lk[4], (MLP_DIM, WIDTH), jnp.float32)    # c_fc.weight
        fc_b = 0.02 * jax.random.normal(lk[5], (MLP_DIM,), jnp.float32)
        pr_w = 0.02 * jax.random.normal(lk[6], (WIDTH, MLP_DIM), jnp.float32)    # c_proj.weight
        pr_b = 0.02 * jax.random.normal(lk[7], (WIDTH,), jnp.float32)

        # x @ in_proj_w.T ; columns = [q | k | v].  Fold the 1/sqrt(head_dim)
        # attention scale into the Q columns at init (constant fold, runtime-free).
        in_w_t = in_w.T                                                  # (D, 3D)
        in_w_t = jnp.concatenate(
            [in_w_t[:, :WIDTH] * attn_scale, in_w_t[:, WIDTH:]], axis=1)
        in_b_s = jnp.concatenate([in_b[:WIDTH] * attn_scale, in_b[WIDTH:]])
        wqkv.append(in_w_t)
        bqkv.append(in_b_s.reshape(1, 3 * WIDTH))
        wo.append(out_w.T)                         # concat_heads @ out_proj_w.T
        bo.append(out_b.reshape(1, WIDTH))
        w_fc.append(fc_w.T)
        b_fc.append(fc_b.reshape(1, MLP_DIM))
        w_proj.append(pr_w.T)
        b_proj.append(pr_b.reshape(1, WIDTH))

    p["wqkv"] = jnp.stack(wqkv).astype(DTYPE)      # (L, D, 3D)
    p["bqkv"] = jnp.stack(bqkv).astype(DTYPE)      # (L, 1, 3D)
    p["wo"] = jnp.stack(wo).astype(DTYPE)          # (L, D, D)
    p["bo"] = jnp.stack(bo).astype(DTYPE)          # (L, 1, D)
    p["w_fc"] = jnp.stack(w_fc).astype(DTYPE)      # (L, D, 4D)
    p["b_fc"] = jnp.stack(b_fc).astype(DTYPE)      # (L, 1, 4D)
    p["w_proj"] = jnp.stack(w_proj).astype(DTYPE)  # (L, 4D, D)
    p["b_proj"] = jnp.stack(b_proj).astype(DTYPE)  # (L, 1, D)
    p["ln1_g"] = jnp.ones((LAYERS, 1, WIDTH), DTYPE)
    p["ln1_b"] = jnp.zeros((LAYERS, 1, WIDTH), DTYPE)
    p["ln2_g"] = jnp.ones((LAYERS, 1, WIDTH), DTYPE)
    p["ln2_b"] = jnp.zeros((LAYERS, 1, WIDTH), DTYPE)

    p["ln_post_g"] = jnp.ones((1, WIDTH), DTYPE)
    p["ln_post_b"] = jnp.zeros((1, WIDTH), DTYPE)
    p["proj"] = nrm(next(ks), (WIDTH, EMBED))

    # text_features stand-in (already L2-normalized, as in __init__), passed
    # pre-transposed so the kernel does img @ text.T without an in-kernel transpose.
    # TODO(synk): the real module encodes tokenized class prompts with CLIP's text
    # transformer loaded from a checkpoint; replaced by synthetic normalized embeddings.
    tf = jax.random.normal(next(ks), (N_CLASSES, EMBED), jnp.float32)
    tf = tf / jnp.linalg.norm(tf, axis=-1, keepdims=True)
    p["text_features_t"] = tf.T.astype(DTYPE)                        # (E, Ncls)

    # deep_prompt = nn.Parameter(torch.randn(prompt_num, 1, embedding_dim)),
    # expanded into the padded (B*S_PAD, D) token layout (same values per batch).
    # prompt_keep is 0 exactly at the prompt rows, 1 elsewhere, so the in-kernel
    # injection is a single multiply-add (no iota / select inside the kernel).
    deep_prompt = jax.random.normal(next(ks), (PROMPT_NUM, 1, WIDTH),
                                    jnp.float32).astype(DTYPE)
    fill_one = jnp.concatenate(
        [jnp.zeros((S0, WIDTH), DTYPE),
         deep_prompt[:, 0, :],
         jnp.zeros((S_PAD - S_FULL, WIDTH), DTYPE)], axis=0)         # (S_PAD, D)
    keep_one = jnp.concatenate(
        [jnp.ones((S0, WIDTH), DTYPE),
         jnp.zeros((PROMPT_NUM, WIDTH), DTYPE),
         jnp.ones((S_PAD - S_FULL, WIDTH), DTYPE)], axis=0)          # (S_PAD, D)
    p["prompt_fill"] = jnp.tile(fill_one, (B, 1))                    # (B*S_PAD, D)
    p["prompt_keep"] = jnp.tile(keep_one, (B, 1))                    # (B*S_PAD, D)

    # logit_scale = clip_model.logit_scale.exp()   (CLIP init: log(1/0.07))
    p["logit_scale"] = jnp.full((1, 1), 1.0 / 0.07, jnp.float32)     # SMEM scalar
    return p


if __name__ == "__main__":
    key = jax.random.PRNGKey(0)
    pkey, ikey = jax.random.split(key)
    params = init_params(pkey)
    images = jax.random.normal(ikey, (B, C_IN, IMG, IMG), DTYPE)     # NCHW, like PyTorch

    logits = jax.jit(deep_prompt_clip_forward)(images, params)
    jax.block_until_ready(logits)
    assert logits.shape == (B, N_CLASSES) and logits.dtype == DTYPE
    print("KERNEL_OK")
</pallas_src>

<mosaic_0001>
module attributes {stable_mosaic.version = 11 : i64} {
  func.func @_fused_forward_kernel(%arg0: memref<16x192xf32, #tpu.memory_space<vmem>>, %arg1: memref<192x32xf32, #tpu.memory_space<vmem>>, %arg2: memref<16x32xf32, #tpu.memory_space<vmem>>, %arg3: memref<1x32xf32, #tpu.memory_space<vmem>>, %arg4: memref<1x32xf32, #tpu.memory_space<vmem>>, %arg5: memref<2x1x32xf32, #tpu.memory_space<vmem>>, %arg6: memref<2x1x32xf32, #tpu.memory_space<vmem>>, %arg7: memref<2x32x96xf32, #tpu.memory_space<vmem>>, %arg8: memref<2x1x96xf32, #tpu.memory_space<vmem>>, %arg9: memref<2x32x32xf32, #tpu.memory_space<vmem>>, %arg10: memref<2x1x32xf32, #tpu.memory_space<vmem>>, %arg11: memref<2x1x32xf32, #tpu.memory_space<vmem>>, %arg12: memref<2x1x32xf32, #tpu.memory_space<vmem>>, %arg13: memref<2x32x128xf32, #tpu.memory_space<vmem>>, %arg14: memref<2x1x128xf32, #tpu.memory_space<vmem>>, %arg15: memref<2x128x32xf32, #tpu.memory_space<vmem>>, %arg16: memref<2x1x32xf32, #tpu.memory_space<vmem>>, %arg17: memref<16x32xf32, #tpu.memory_space<vmem>>, %arg18: memref<16x32xf32, #tpu.memory_space<vmem>>, %arg19: memref<1x32xf32, #tpu.memory_space<vmem>>, %arg20: memref<1x32xf32, #tpu.memory_space<vmem>>, %arg21: memref<32x16xf32, #tpu.memory_space<vmem>>, %arg22: memref<16x3xf32, #tpu.memory_space<vmem>>, %arg23: memref<1x1xf32, #tpu.memory_space<smem>>, %arg24: memref<2x3xf32, #tpu.memory_space<vmem>>) attributes {dimension_semantics = [], scalar_prefetch = 0 : i64, scratch_operands = 0 : i64, tpu.core_type = #tpu.core_type<tc>} {
    %c0 = arith.constant 0 : index
    %c0_0 = arith.constant 0 : index
    %0 = vector.load %arg0[%c0, %c0_0] : memref<16x192xf32, #tpu.memory_space<vmem>>, vector<16x192xf32>
    %c0_1 = arith.constant 0 : index
    %c0_2 = arith.constant 0 : index
    %1 = vector.load %arg1[%c0_1, %c0_2] : memref<192x32xf32, #tpu.memory_space<vmem>>, vector<192x32xf32>
    %cst = arith.constant dense<0.000000e+00> : vector<16x32xf32>
    %2 = tpu.matmul %0, %1, %cst {dimension_numbers = #tpu.dot_dimension_numbers<[1], [0], [0], [1], [0, 0, 1, 1], [], []>} : vector<16x192xf32>, vector<192x32xf32>, vector<16x32xf32> -> vector<16x32xf32>
    %c0_3 = arith.constant 0 : index
    %c0_4 = arith.constant 0 : index
    %3 = vector.load %arg2[%c0_3, %c0_4] : memref<16x32xf32, #tpu.memory_space<vmem>>, vector<16x32xf32>
    %4 = arith.addf %2, %3 : vector<16x32xf32>
    %c0_5 = arith.constant 0 : index
    %c0_6 = arith.constant 0 : index
    %5 = vector.load %arg3[%c0_5, %c0_6] : memref<1x32xf32, #tpu.memory_space<vmem>>, vector<1x32xf32>
    %c0_7 = arith.constant 0 : index
    %c0_8 = arith.constant 0 : index
    %6 = vector.load %arg4[%c0_7, %c0_8] : memref<1x32xf32, #tpu.memory_space<vmem>>, vector<1x32xf32>
    %cst_9 = arith.constant dense<0.000000e+00> : vector<16xf32>
    %7 = vector.multi_reduction <add>, %4, %cst_9 [1] : vector<16x32xf32> to vector<16xf32>
    %8 = vector.shape_cast %7 : vector<16xf32> to vector<16x1xf32>
    %cst_10 = arith.constant 3.200000e+01 : f32
    %9 = vector.broadcast %cst_10 : f32 to vector<16x1xf32>
    %10 = arith.divf %8, %9 : vector<16x1xf32>
    %11 = vector.broadcast %10 : vector<16x1xf32> to vector<16x32xf32>
    %12 = arith.subf %4, %11 : vector<16x32xf32>
    %13 = arith.mulf %12, %12 : vector<16x32xf32>
    %cst_11 = arith.constant dense<0.000000e+00> : vector<16xf32>
    %14 = vector.multi_reduction <add>, %13, %cst_11 [1] : vector<16x32xf32> to vector<16xf32>
    %15 = vector.shape_cast %14 : vector<16xf32> to vector<16x1xf32>
    %cst_12 = arith.constant 3.200000e+01 : f32
    %16 = vector.broadcast %cst_12 : f32 to vector<16x1xf32>
    %17 = arith.divf %15, %16 : vector<16x1xf32>
    %cst_13 = arith.constant 9.99999974E-6 : f32
    %18 = vector.broadcast %cst_13 : f32 to vector<16x1xf32>
    %19 = arith.addf %17, %18 : vector<16x1xf32>
    %20 = math.rsqrt %19 : vector<16x1xf32>
    %21 = vector.broadcast %20 : vector<16x1xf32> to vector<16x32xf32>
    %22 = arith.mulf %12, %21 : vector<16x32xf32>
    %23 = vector.broadcast %5 : vector<1x32xf32> to vector<16x32xf32>
    %24 = arith.mulf %22, %23 : vector<16x32xf32>
    %25 = vector.broadcast %6 : vector<1x32xf32> to vector<16x32xf32>
    %26 = arith.addf %24, %25 : vector<16x32xf32>
    %27 = tpu.iota {dimensions = array<i32: 2>} : vector<1x1x8xi32>
    %c5_i32 = arith.constant 5 : i32
    %28 = vector.broadcast %c5_i32 : i32 to vector<1x1x8xi32>
    %29 = arith.cmpi slt, %27, %28 : vector<1x1x8xi32>
    %cst_14 = arith.constant 0.000000e+00 : f32
    %cst_15 = arith.constant -1.000000e+30 : f32
    %30 = vector.broadcast %cst_14 : f32 to vector<1x1x8xf32>
    %31 = vector.broadcast %cst_15 : f32 to vector<1x1x8xf32>
    %32 = arith.select %29, %30, %31 : vector<1x1x8xi1>, vector<1x1x8xf32>
    %c7_i32 = arith.constant 7 : i32
    %33 = vector.broadcast %c7_i32 : i32 to vector<1x1x8xi32>
    %34 = arith.cmpi slt, %27, %33 : vector<1x1x8xi32>
    %cst_16 = arith.constant 0.000000e+00 : f32
    %cst_17 = arith.constant -1.000000e+30 : f32
    %35 = vector.broadcast %cst_16 : f32 to vector<1x1x8xf32>
    %36 = vector.broadcast %cst_17 : f32 to vector<1x1x8xf32>
    %37 = arith.select %34, %35, %36 : vector<1x1x8xi1>, vector<1x1x8xf32>
    %c0_18 = arith.constant 0 : index
    %c0_19 = arith.constant 0 : index
    %c0_20 = arith.constant 0 : index
    %38 = vector.load %arg5[%c0_18, %c0_19, %c0_20] : memref<2x1x32xf32, #tpu.memory_space<vmem>>, vector<1x1x32xf32>
    %39 = vector.shape_cast %38 : vector<1x1x32xf32> to vector<1x32xf32>
    %c0_21 = arith.constant 0 : index
    %c0_22 = arith.constant 0 : index
    %c0_23 = arith.constant 0 : index
    %40 = vector.load %arg6[%c0_21, %c0_22, %c0_23] : memref<2x1x32xf32, #tpu.memory_space<vmem>>, vector<1x1x32xf32>
    %41 = vector.shape_cast %40 : vector<1x1x32xf32> to vector<1x32xf32>
    %cst_24 = arith.constant dense<0.000000e+00> : vector<16xf32>
    %42 = vector.multi_reduction <add>, %26, %cst_24 [1] : vector<16x32xf32> to vector<16xf32>
    %43 = vector.shape_cast %42 : vector<16xf32> to vector<16x1xf32>
    %cst_25 = arith.constant 3.200000e+01 : f32
    %44 = vector.broadcast %cst_25 : f32 to vector<16x1xf32>
    %45 = arith.divf %43, %44 : vector<16x1xf32>
    %46 = vector.broadcast %45 : vector<16x1xf32> to vector<16x32xf32>
    %47 = arith.subf %26, %46 : vector<16x32xf32>
    %48 = arith.mulf %47, %47 : vector<16x32xf32>
    %cst_26 = arith.constant dense<0.000000e+00> : vector<16xf32>
    %49 = vector.multi_reduction <add>, %48, %cst_26 [1] : vector<16x32xf32> to vector<16xf32>
    %50 = vector.shape_cast %49 : vector<16xf32> to vector<16x1xf32>
    %cst_27 = arith.constant 3.200000e+01 : f32
    %51 = vector.broadcast %cst_27 : f32 to vector<16x1xf32>
    %52 = arith.divf %50, %51 : vector<16x1xf32>
    %cst_28 = arith.constant 9.99999974E-6 : f32
    %53 = vector.broadcast %cst_28 : f32 to vector<16x1xf32>
    %54 = arith.addf %52, %53 : vector<16x1xf32>
    %55 = math.rsqrt %54 : vector<16x1xf32>
    %56 = vector.broadcast %55 : vector<16x1xf32> to vector<16x32xf32>
    %57 = arith.mulf %47, %56 : vector<16x32xf32>
    %58 = vector.broadcast %39 : vector<1x32xf32> to vector<16x32xf32>
    %59 = arith.mulf %57, %58 : vector<16x32xf32>
    %60 = vector.broadcast %41 : vector<1x32xf32> to vector<16x32xf32>
    %61 = arith.addf %59, %60 : vector<16x32xf32>
    %c0_29 = arith.constant 0 : index
    %c0_30 = arith.constant 0 : index
    %c0_31 = arith.constant 0 : index
    %62 = vector.load %arg7[%c0_29, %c0_30, %c0_31] : memref<2x32x96xf32, #tpu.memory_space<vmem>>, vector<1x32x96xf32>
    %63 = vector.shape_cast %62 : vector<1x32x96xf32> to vector<32x96xf32>
    %cst_32 = arith.constant dense<0.000000e+00> : vector<16x96xf32>
    %64 = tpu.matmul %61, %63, %cst_32 {dimension_numbers = #tpu.dot_dimension_numbers<[1], [0], [0], [1], [0, 0, 1, 1], [], []>} : vector<16x32xf32>, vector<32x96xf32>, vector<16x96xf32> -> vector<16x96xf32>
    %c0_33 = arith.constant 0 : index
    %c0_34 = arith.constant 0 : index
    %c0_35 = arith.constant 0 : index
    %65 = vector.load %arg8[%c0_33, %c0_34, %c0_35] : memref<2x1x96xf32, #tpu.memory_space<vmem>>, vector<1x1x96xf32>
    %66 = vector.shape_cast %65 : vector<1x1x96xf32> to vector<1x96xf32>
    %67 = vector.broadcast %66 : vector<1x96xf32> to vector<16x96xf32>
    %68 = arith.addf %64, %67 : vector<16x96xf32>
    %69 = vector.extract_strided_slice %68 {offsets = [0, 0], sizes = [16, 8], strides = [1, 1]} : vector<16x96xf32> to vector<16x8xf32>
    %70 = vector.extract_strided_slice %68 {offsets = [0, 32], sizes = [16, 8], strides = [1, 1]} : vector<16x96xf32> to vector<16x8xf32>
    %71 = vector.extract_strided_slice %68 {offsets = [0, 64], sizes = [16, 8], strides = [1, 1]} : vector<16x96xf32> to vector<16x8xf32>
    %72 = vector.shape_cast %69 : vector<16x8xf32> to vector<2x8x8xf32>
    %73 = vector.shape_cast %70 : vector<16x8xf32> to vector<2x8x8xf32>
    %74 = vector.shape_cast %71 : vector<16x8xf32> to vector<2x8x8xf32>
    "tpu.trace_start"() <{level = 10 : i32, message = "bqd,bkd->bqk"}> : () -> ()
    %cst_36 = arith.constant dense<0.000000e+00> : vector<2x8x8xf32>
    %75 = tpu.matmul %72, %73, %cst_36 {dimension_numbers = #tpu.dot_dimension_numbers<[2], [2], [1], [1], [0, 0, 0, 1, 1, 1], [0], [0]>} : vector<2x8x8xf32>, vector<2x8x8xf32>, vector<2x8x8xf32> -> vector<2x8x8xf32>
    "tpu.trace_stop"() : () -> ()
    %76 = vector.broadcast %32 : vector<1x1x8xf32> to vector<2x8x8xf32>
    %77 = arith.addf %75, %76 : vector<2x8x8xf32>
    %cst_37 = arith.constant dense<0xFF800000> : vector<2x8xf32>
    %78 = vector.multi_reduction <maximumf>, %77, %cst_37 [2] : vector<2x8x8xf32> to vector<2x8xf32>
    %79 = vector.shape_cast %78 : vector<2x8xf32> to vector<2x8x1xf32>
    %80 = vector.broadcast %79 : vector<2x8x1xf32> to vector<2x8x8xf32>
    %81 = arith.subf %77, %80 : vector<2x8x8xf32>
    %82 = math.exp %81 : vector<2x8x8xf32>
    %cst_38 = arith.constant dense<0.000000e+00> : vector<2x8xf32>
    %83 = vector.multi_reduction <add>, %82, %cst_38 [2] : vector<2x8x8xf32> to vector<2x8xf32>
    %84 = vector.shape_cast %83 : vector<2x8xf32> to vector<2x8x1xf32>
    %85 = tpu.reciprocal %84 {approx = true} : vector<2x8x1xf32> -> vector<2x8x1xf32>
    %86 = vector.broadcast %85 : vector<2x8x1xf32> to vector<2x8x8xf32>
    %87 = arith.mulf %82, %86 : vector<2x8x8xf32>
    "tpu.trace_start"() <{level = 10 : i32, message = "bqk,bkd->bqd"}> : () -> ()
    %cst_39 = arith.constant dense<0.000000e+00> : vector<2x8x8xf32>
    %88 = tpu.matmul %87, %74, %cst_39 {dimension_numbers = #tpu.dot_dimension_numbers<[2], [1], [1], [2], [0, 0, 0, 1, 1, 2], [0], [0]>} : vector<2x8x8xf32>, vector<2x8x8xf32>, vector<2x8x8xf32> -> vector<2x8x8xf32>
    "tpu.trace_stop"() : () -> ()
    %89 = vector.shape_cast %88 : vector<2x8x8xf32> to vector<16x8xf32>
    %90 = vector.extract_strided_slice %68 {offsets = [0, 8], sizes = [16, 8], strides = [1, 1]} : vector<16x96xf32> to vector<16x8xf32>
    %91 = vector.extract_strided_slice %68 {offsets = [0, 40], sizes = [16, 8], strides = [1, 1]} : vector<16x96xf32> to vector<16x8xf32>
    %92 = vector.extract_strided_slice %68 {offsets = [0, 72], sizes = [16, 8], strides = [1, 1]} : vector<16x96xf32> to vector<16x8xf32>
    %93 = vector.shape_cast %90 : vector<16x8xf32> to vector<2x8x8xf32>
    %94 = vector.shape_cast %91 : vector<16x8xf32> to vector<2x8x8xf32>
    %95 = vector.shape_cast %92 : vector<16x8xf32> to vector<2x8x8xf32>
    "tpu.trace_start"() <{level = 10 : i32, message = "bqd,bkd->bqk"}> : () -> ()
    %cst_40 = arith.constant dense<0.000000e+00> : vector<2x8x8xf32>
    %96 = tpu.matmul %93, %94, %cst_40 {dimension_numbers = #tpu.dot_dimension_numbers<[2], [2], [1], [1], [0, 0, 0, 1, 1, 1], [0], [0]>} : vector<2x8x8xf32>, vector<2x8x8xf32>, vector<2x8x8xf32> -> vector<2x8x8xf32>
    "tpu.trace_stop"() : () -> ()
    %97 = vector.broadcast %32 : vector<1x1x8xf32> to vector<2x8x8xf32>
    %98 = arith.addf %96, %97 : vector<2x8x8xf32>
    %cst_41 = arith.constant dense<0xFF800000> : vector<2x8xf32>
    %99 = vector.multi_reduction <maximumf>, %98, %cst_41 [2] : vector<2x8x8xf32> to vector<2x8xf32>
    %100 = vector.shape_cast %99 : vector<2x8xf32> to vector<2x8x1xf32>
    %101 = vector.broadcast %100 : vector<2x8x1xf32> to vector<2x8x8xf32>
    %102 = arith.subf %98, %101 : vector<2x8x8xf32>
    %103 = math.exp %102 : vector<2x8x8xf32>
    %cst_42 = arith.constant dense<0.000000e+00> : vector<2x8xf32>
    %104 = vector.multi_reduction <add>, %103, %cst_42 [2] : vector<2x8x8xf32> to vector<2x8xf32>
    %105 = vector.shape_cast %104 : vector<2x8xf32> to vector<2x8x1xf32>
    %106 = tpu.reciprocal %105 {approx = true} : vector<2x8x1xf32> -> vector<2x8x1xf32>
    %107 = vector.broadcast %106 : vector<2x8x1xf32> to vector<2x8x8xf32>
    %108 = arith.mulf %103, %107 : vector<2x8x8xf32>
    "tpu.trace_start"() <{level = 10 : i32, message = "bqk,bkd->bqd"}> : () -> ()
    %cst_43 = arith.constant dense<0.000000e+00> : vector<2x8x8xf32>
    %109 = tpu.matmul %108, %95, %cst_43 {dimension_numbers = #tpu.dot_dimension_numbers<[2], [1], [1], [2], [0, 0, 0, 1, 1, 2], [0], [0]>} : vector<2x8x8xf32>, vector<2x8x8xf32>, vector<2x8x8xf32> -> vector<2x8x8xf32>
    "tpu.trace_stop"() : () -> ()
    %110 = vector.shape_cast %109 : vector<2x8x8xf32> to vector<16x8xf32>
    %111 = vector.extract_strided_slice %68 {offsets = [0, 16], sizes = [16, 8], strides = [1, 1]} : vector<16x96xf32> to vector<16x8xf32>
    %112 = vector.extract_strided_slice %68 {offsets = [0, 48], sizes = [16, 8], strides = [1, 1]} : vector<16x96xf32> to vector<16x8xf32>
    %113 = vector.extract_strided_slice %68 {offsets = [0, 80], sizes = [16, 8], strides = [1, 1]} : vector<16x96xf32> to vector<16x8xf32>
    %114 = vector.shape_cast %111 : vector<16x8xf32> to vector<2x8x8xf32>
    %115 = vector.shape_cast %112 : vector<16x8xf32> to vector<2x8x8xf32>
    %116 = vector.shape_cast %113 : vector<16x8xf32> to vector<2x8x8xf32>
    "tpu.trace_start"() <{level = 10 : i32, message = "bqd,bkd->bqk"}> : () -> ()
    %cst_44 = arith.constant dense<0.000000e+00> : vector<2x8x8xf32>
    %117 = tpu.matmul %114, %115, %cst_44 {dimension_numbers = #tpu.dot_dimension_numbers<[2], [2], [1], [1], [0, 0, 0, 1, 1, 1], [0], [0]>} : vector<2x8x8xf32>, vector<2x8x8xf32>, vector<2x8x8xf32> -> vector<2x8x8xf32>
    "tpu.trace_stop"() : () -> ()
    %118 = vector.broadcast %32 : vector<1x1x8xf32> to vector<2x8x8xf32>
    %119 = arith.addf %117, %118 : vector<2x8x8xf32>
    %cst_45 = arith.constant dense<0xFF800000> : vector<2x8xf32>
    %120 = vector.multi_reduction <maximumf>, %119, %cst_45 [2] : vector<2x8x8xf32> to vector<2x8xf32>
    %121 = vector.shape_cast %120 : vector<2x8xf32> to vector<2x8x1xf32>
    %122 = vector.broadcast %121 : vector<2x8x1xf32> to vector<2x8x8xf32>
    %123 = arith.subf %119, %122 : vector<2x8x8xf32>
    %124 = math.exp %123 : vector<2x8x8xf32>
    %cst_46 = arith.constant dense<0.000000e+00> : vector<2x8xf32>
    %125 = vector.multi_reduction <add>, %124, %cst_46 [2] : vector<2x8x8xf32> to vector<2x8xf32>
    %126 = vector.shape_cast %125 : vector<2x8xf32> to vector<2x8x1xf32>
    %127 = tpu.reciprocal %126 {approx = true} : vector<2x8x1xf32> -> vector<2x8x1xf32>
    %128 = vector.broadcast %127 : vector<2x8x1xf32> to vector<2x8x8xf32>
    %129 = arith.mulf %124, %128 : vector<2x8x8xf32>
    "tpu.trace_start"() <{level = 10 : i32, message = "bqk,bkd->bqd"}> : () -> ()
    %cst_47 = arith.constant dense<0.000000e+00> : vector<2x8x8xf32>
    %130 = tpu.matmul %129, %116, %cst_47 {dimension_numbers = #tpu.dot_dimension_numbers<[2], [1], [1], [2], [0, 0, 0, 1, 1, 2], [0], [0]>} : vector<2x8x8xf32>, vector<2x8x8xf32>, vector<2x8x8xf32> -> vector<2x8x8xf32>
    "tpu.trace_stop"() : () -> ()
    %131 = vector.shape_cast %130 : vector<2x8x8xf32> to vector<16x8xf32>
    %132 = vector.extract_strided_slice %68 {offsets = [0, 24], sizes = [16, 8], strides = [1, 1]} : vector<16x96xf32> to vector<16x8xf32>
    %133 = vector.extract_strided_slice %68 {offsets = [0, 56], sizes = [16, 8], strides = [1, 1]} : vector<16x96xf32> to vector<16x8xf32>
    %134 = vector.extract_strided_slice %68 {offsets = [0, 88], sizes = [16, 8], strides = [1, 1]} : vector<16x96xf32> to vector<16x8xf32>
    %135 = vector.shape_cast %132 : vector<16x8xf32> to vector<2x8x8xf32>
    %136 = vector.shape_cast %133 : vector<16x8xf32> to vector<2x8x8xf32>
    %137 = vector.shape_cast %134 : vector<16x8xf32> to vector<2x8x8xf32>
    "tpu.trace_start"() <{level = 10 : i32, message = "bqd,bkd->bqk"}> : () -> ()
    %cst_48 = arith.constant dense<0.000000e+00> : vector<2x8x8xf32>
    %138 = tpu.matmul %135, %136, %cst_48 {dimension_numbers = #tpu.dot_dimension_numbers<[2], [2], [1], [1], [0, 0, 0, 1, 1, 1], [0], [0]>} : vector<2x8x8xf32>, vector<2x8x8xf32>, vector<2x8x8xf32> -> vector<2x8x8xf32>
    "tpu.trace_stop"() : () -> ()
    %139 = vector.broadcast %32 : vector<1x1x8xf32> to vector<2x8x8xf32>
    %140 = arith.addf %138, %139 : vector<2x8x8xf32>
    %cst_49 = arith.constant dense<0xFF800000> : vector<2x8xf32>
    %141 = vector.multi_reduction <maximumf>, %140, %cst_49 [2] : vector<2x8x8xf32> to vector<2x8xf32>
    %142 = vector.shape_cast %141 : vector<2x8xf32> to vector<2x8x1xf32>
    %143 = vector.broadcast %142 : vector<2x8x1xf32> to vector<2x8x8xf32>
    %144 = arith.subf %140, %143 : vector<2x8x8xf32>
    %145 = math.exp %144 : vector<2x8x8xf32>
    %cst_50 = arith.constant dense<0.000000e+00> : vector<2x8xf32>
    %146 = vector.multi_reduction <add>, %145, %cst_50 [2] : vector<2x8x8xf32> to vector<2x8xf32>
    %147 = vector.shape_cast %146 : vector<2x8xf32> to vector<2x8x1xf32>
    %148 = tpu.reciprocal %147 {approx = true} : vector<2x8x1xf32> -> vector<2x8x1xf32>
    %149 = vector.broadcast %148 : vector<2x8x1xf32> to vector<2x8x8xf32>
    %150 = arith.mulf %145, %149 : vector<2x8x8xf32>
    "tpu.trace_start"() <{level = 10 : i32, message = "bqk,bkd->bqd"}> : () -> ()
    %cst_51 = arith.constant dense<0.000000e+00> : vector<2x8x8xf32>
    %151 = tpu.matmul %150, %137, %cst_51 {dimension_numbers = #tpu.dot_dimension_numbers<[2], [1], [1], [2], [0, 0, 0, 1, 1, 2], [0], [0]>} : vector<2x8x8xf32>, vector<2x8x8xf32>, vector<2x8x8xf32> -> vector<2x8x8xf32>
    "tpu.trace_stop"() : () -> ()
    %152 = vector.shape_cast %151 : vector<2x8x8xf32> to vector<16x8xf32>
    %153 = tpu.concatenate %89, %110, %131, %152 in 1 : vector<16x8xf32>, vector<16x8xf32>, vector<16x8xf32>, vector<16x8xf32> -> vector<16x32xf32>
    %c0_52 = arith.constant 0 : index
    %c0_53 = arith.constant 0 : index
    %c0_54 = arith.constant 0 : index
    %154 = vector.load %arg9[%c0_52, %c0_53, %c0_54] : memref<2x32x32xf32, #tpu.memory_space<vmem>>, vector<1x32x32xf32>
    %155 = vector.shape_cast %154 : vector<1x32x32xf32> to vector<32x32xf32>
    %cst_55 = arith.constant dense<0.000000e+00> : vector<16x32xf32>
    %156 = tpu.matmul %153, %155, %cst_55 {dimension_numbers = #tpu.dot_dimension_numbers<[1], [0], [0], [1], [0, 0, 1, 1], [], []>} : vector<16x32xf32>, vector<32x32xf32>, vector<16x32xf32> -> vector<16x32xf32>
    %c0_56 = arith.constant 0 : index
    %c0_57 = arith.constant 0 : index
    %c0_58 = arith.constant 0 : index
    %157 = vector.load %arg10[%c0_56, %c0_57, %c0_58] : memref<2x1x32xf32, #tpu.memory_space<vmem>>, vector<1x1x32xf32>
    %158 = vector.shape_cast %157 : vector<1x1x32xf32> to vector<1x32xf32>
    %159 = vector.broadcast %158 : vector<1x32xf32> to vector<16x32xf32>
    %160 = arith.addf %156, %159 : vector<16x32xf32>
    %161 = arith.addf %26, %160 : vector<16x32xf32>
    %c0_59 = arith.constant 0 : index
    %c0_60 = arith.constant 0 : index
    %c0_61 = arith.constant 0 : index
    %162 = vector.load %arg11[%c0_59, %c0_60, %c0_61] : memref<2x1x32xf32, #tpu.memory_space<vmem>>, vector<1x1x32xf32>
    %163 = vector.shape_cast %162 : vector<1x1x32xf32> to vector<1x32xf32>
    %c0_62 = arith.constant 0 : index
    %c0_63 = arith.constant 0 : index
    %c0_64 = arith.constant 0 : index
    %164 = vector.load %arg12[%c0_62, %c0_63, %c0_64] : memref<2x1x32xf32, #tpu.memory_space<vmem>>, vector<1x1x32xf32>
    %165 = vector.shape_cast %164 : vector<1x1x32xf32> to vector<1x32xf32>
    %cst_65 = arith.constant dense<0.000000e+00> : vector<16xf32>
    %166 = vector.multi_reduction <add>, %161, %cst_65 [1] : vector<16x32xf32> to vector<16xf32>
    %167 = vector.shape_cast %166 : vector<16xf32> to vector<16x1xf32>
    %cst_66 = arith.constant 3.200000e+01 : f32
    %168 = vector.broadcast %cst_66 : f32 to vector<16x1xf32>
    %169 = arith.divf %167, %168 : vector<16x1xf32>
    %170 = vector.broadcast %169 : vector<16x1xf32> to vector<16x32xf32>
    %171 = arith.subf %161, %170 : vector<16x32xf32>
    %172 = arith.mulf %171, %171 : vector<16x32xf32>
    %cst_67 = arith.constant dense<0.000000e+00> : vector<16xf32>
    %173 = vector.multi_reduction <add>, %172, %cst_67 [1] : vector<16x32xf32> to vector<16xf32>
    %174 = vector.shape_cast %173 : vector<16xf32> to vector<16x1xf32>
    %cst_68 = arith.constant 3.200000e+01 : f32
    %175 = vector.broadcast %cst_68 : f32 to vector<16x1xf32>
    %176 = arith.divf %174, %175 : vector<16x1xf32>
    %cst_69 = arith.constant 9.99999974E-6 : f32
    %177 = vector.broadcast %cst_69 : f32 to vector<16x1xf32>
    %178 = arith.addf %176, %177 : vector<16x1xf32>
    %179 = math.rsqrt %178 : vector<16x1xf32>
    %180 = vector.broadcast %179 : vector<16x1xf32> to vector<16x32xf32>
    %181 = arith.mulf %171, %180 : vector<16x32xf32>
    %182 = vector.broadcast %163 : vector<1x32xf32> to vector<16x32xf32>
    %183 = arith.mulf %181, %182 : vector<16x32xf32>
    %184 = vector.broadcast %165 : vector<1x32xf32> to vector<16x32xf32>
    %185 = arith.addf %183, %184 : vector<16x32xf32>
    %c0_70 = arith.constant 0 : index
    %c0_71 = arith.constant 0 : index
    %c0_72 = arith.constant 0 : index
    %186 = vector.load %arg13[%c0_70, %c0_71, %c0_72] : memref<2x32x128xf32, #tpu.memory_space<vmem>>, vector<1x32x128xf32>
    %187 = vector.shape_cast %186 : vector<1x32x128xf32> to vector<32x128xf32>
    %cst_73 = arith.constant dense<0.000000e+00> : vector<16x128xf32>
    %188 = tpu.matmul %185, %187, %cst_73 {dimension_numbers = #tpu.dot_dimension_numbers<[1], [0], [0], [1], [0, 0, 1, 1], [], []>} : vector<16x32xf32>, vector<32x128xf32>, vector<16x128xf32> -> vector<16x128xf32>
    %c0_74 = arith.constant 0 : index
    %c0_75 = arith.constant 0 : index
    %c0_76 = arith.constant 0 : index
    %189 = vector.load %arg14[%c0_74, %c0_75, %c0_76] : memref<2x1x128xf32, #tpu.memory_space<vmem>>, vector<1x1x128xf32>
    %190 = vector.shape_cast %189 : vector<1x1x128xf32> to vector<1x128xf32>
    %191 = vector.broadcast %190 : vector<1x128xf32> to vector<16x128xf32>
    %192 = arith.addf %188, %191 : vector<16x128xf32>
    %cst_77 = arith.constant -1.702000e+00 : f32
    %193 = vector.broadcast %cst_77 : f32 to vector<16x128xf32>
    %194 = arith.mulf %193, %192 : vector<16x128xf32>
    %195 = math.exp %194 : vector<16x128xf32>
    %cst_78 = arith.constant 1.000000e+00 : f32
    %196 = vector.broadcast %cst_78 : f32 to vector<16x128xf32>
    %197 = arith.addf %196, %195 : vector<16x128xf32>
    %cst_79 = arith.constant 1.000000e+00 : f32
    %198 = vector.broadcast %cst_79 : f32 to vector<16x128xf32>
    %199 = arith.divf %198, %197 : vector<16x128xf32>
    %200 = arith.mulf %192, %199 : vector<16x128xf32>
    %c0_80 = arith.constant 0 : index
    %c0_81 = arith.constant 0 : index
    %c0_82 = arith.constant 0 : index
    %201 = vector.load %arg15[%c0_80, %c0_81, %c0_82] : memref<2x128x32xf32, #tpu.memory_space<vmem>>, vector<1x128x32xf32>
    %202 = vector.shape_cast %201 : vector<1x128x32xf32> to vector<128x32xf32>
    %cst_83 = arith.constant dense<0.000000e+00> : vector<16x32xf32>
    %203 = tpu.matmul %200, %202, %cst_83 {dimension_numbers = #tpu.dot_dimension_numbers<[1], [0], [0], [1], [0, 0, 1, 1], [], []>} : vector<16x128xf32>, vector<128x32xf32>, vector<16x32xf32> -> vector<16x32xf32>
    %c0_84 = arith.constant 0 : index
    %c0_85 = arith.constant 0 : index
    %c0_86 = arith.constant 0 : index
    %204 = vector.load %arg16[%c0_84, %c0_85, %c0_86] : memref<2x1x32xf32, #tpu.memory_space<vmem>>, vector<1x1x32xf32>
    %205 = vector.shape_cast %204 : vector<1x1x32xf32> to vector<1x32xf32>
    %206 = vector.broadcast %205 : vector<1x32xf32> to vector<16x32xf32>
    %207 = arith.addf %203, %206 : vector<16x32xf32>
    %208 = arith.addf %161, %207 : vector<16x32xf32>
    %c0_87 = arith.constant 0 : index
    %c0_88 = arith.constant 0 : index
    %209 = vector.load %arg17[%c0_87, %c0_88] : memref<16x32xf32, #tpu.memory_space<vmem>>, vector<16x32xf32>
    %210 = arith.mulf %208, %209 : vector<16x32xf32>
    %c0_89 = arith.constant 0 : index
    %c0_90 = arith.constant 0 : index
    %211 = vector.load %arg18[%c0_89, %c0_90] : memref<16x32xf32, #tpu.memory_space<vmem>>, vector<16x32xf32>
    %212 = arith.addf %210, %211 : vector<16x32xf32>
    %c1 = arith.constant 1 : index
    %c0_91 = arith.constant 0 : index
    %c0_92 = arith.constant 0 : index
    %213 = vector.load %arg5[%c1, %c0_91, %c0_92] : memref<2x1x32xf32, #tpu.memory_space<vmem>>, vector<1x1x32xf32>
    %214 = vector.shape_cast %213 : vector<1x1x32xf32> to vector<1x32xf32>
    %c1_93 = arith.constant 1 : index
    %c0_94 = arith.constant 0 : index
    %c0_95 = arith.constant 0 : index
    %215 = vector.load %arg6[%c1_93, %c0_94, %c0_95] : memref<2x1x32xf32, #tpu.memory_space<vmem>>, vector<1x1x32xf32>
    %216 = vector.shape_cast %215 : vector<1x1x32xf32> to vector<1x32xf32>
    %cst_96 = arith.constant dense<0.000000e+00> : vector<16xf32>
    %217 = vector.multi_reduction <add>, %212, %cst_96 [1] : vector<16x32xf32> to vector<16xf32>
    %218 = vector.shape_cast %217 : vector<16xf32> to vector<16x1xf32>
    %cst_97 = arith.constant 3.200000e+01 : f32
    %219 = vector.broadcast %cst_97 : f32 to vector<16x1xf32>
    %220 = arith.divf %218, %219 : vector<16x1xf32>
    %221 = vector.broadcast %220 : vector<16x1xf32> to vector<16x32xf32>
    %222 = arith.subf %212, %221 : vector<16x32xf32>
    %223 = arith.mulf %222, %222 : vector<16x32xf32>
    %cst_98 = arith.constant dense<0.000000e+00> : vector<16xf32>
    %224 = vector.multi_reduction <add>, %223, %cst_98 [1] : vector<16x32xf32> to vector<16xf32>
    %225 = vector.shape_cast %224 : vector<16xf32> to vector<16x1xf32>
    %cst_99 = arith.constant 3.200000e+01 : f32
    %226 = vector.broadcast %cst_99 : f32 to vector<16x1xf32>
    %227 = arith.divf %225, %226 : vector<16x1xf32>
    %cst_100 = arith.constant 9.99999974E-6 : f32
    %228 = vector.broadcast %cst_100 : f32 to vector<16x1xf32>
    %229 = arith.addf %227, %228 : vector<16x1xf32>
    %230 = math.rsqrt %229 : vector<16x1xf32>
    %231 = vector.broadcast %230 : vector<16x1xf32> to vector<16x32xf32>
    %232 = arith.mulf %222, %231 : vector<16x32xf32>
    %233 = vector.broadcast %214 : vector<1x32xf32> to vector<16x32xf32>
    %234 = arith.mulf %232, %233 : vector<16x32xf32>
    %235 = vector.broadcast %216 : vector<1x32xf32> to vector<16x32xf32>
    %236 = arith.addf %234, %235 : vector<16x32xf32>
    %c1_101 = arith.constant 1 : index
    %c0_102 = arith.constant 0 : index
    %c0_103 = arith.constant 0 : index
    %237 = vector.load %arg7[%c1_101, %c0_102, %c0_103] : memref<2x32x96xf32, #tpu.memory_space<vmem>>, vector<1x32x96xf32>
    %238 = vector.shape_cast %237 : vector<1x32x96xf32> to vector<32x96xf32>
    %cst_104 = arith.constant dense<0.000000e+00> : vector<16x96xf32>
    %239 = tpu.matmul %236, %238, %cst_104 {dimension_numbers = #tpu.dot_dimension_numbers<[1], [0], [0], [1], [0, 0, 1, 1], [], []>} : vector<16x32xf32>, vector<32x96xf32>, vector<16x96xf32> -> vector<16x96xf32>
    %c1_105 = arith.constant 1 : index
    %c0_106 = arith.constant 0 : index
    %c0_107 = arith.constant 0 : index
    %240 = vector.load %arg8[%c1_105, %c0_106, %c0_107] : memref<2x1x96xf32, #tpu.memory_space<vmem>>, vector<1x1x96xf32>
    %241 = vector.shape_cast %240 : vector<1x1x96xf32> to vector<1x96xf32>
    %242 = vector.broadcast %241 : vector<1x96xf32> to vector<16x96xf32>
    %243 = arith.addf %239, %242 : vector<16x96xf32>
    %244 = vector.extract_strided_slice %243 {offsets = [0, 0], sizes = [16, 8], strides = [1, 1]} : vector<16x96xf32> to vector<16x8xf32>
    %245 = vector.extract_strided_slice %243 {offsets = [0, 32], sizes = [16, 8], strides = [1, 1]} : vector<16x96xf32> to vector<16x8xf32>
    %246 = vector.extract_strided_slice %243 {offsets = [0, 64], sizes = [16, 8], strides = [1, 1]} : vector<16x96xf32> to vector<16x8xf32>
    %247 = vector.shape_cast %244 : vector<16x8xf32> to vector<2x8x8xf32>
    %248 = vector.shape_cast %245 : vector<16x8xf32> to vector<2x8x8xf32>
    %249 = vector.shape_cast %246 : vector<16x8xf32> to vector<2x8x8xf32>
    "tpu.trace_start"() <{level = 10 : i32, message = "bqd,bkd->bqk"}> : () -> ()
    %cst_108 = arith.constant dense<0.000000e+00> : vector<2x8x8xf32>
    %250 = tpu.matmul %247, %248, %cst_108 {dimension_numbers = #tpu.dot_dimension_numbers<[2], [2], [1], [1], [0, 0, 0, 1, 1, 1], [0], [0]>} : vector<2x8x8xf32>, vector<2x8x8xf32>, vector<2x8x8xf32> -> vector<2x8x8xf32>
    "tpu.trace_stop"() : () -> ()
    %251 = vector.broadcast %37 : vector<1x1x8xf32> to vector<2x8x8xf32>
    %252 = arith.addf %250, %251 : vector<2x8x8xf32>
    %cst_109 = arith.constant dense<0xFF800000> : vector<2x8xf32>
    %253 = vector.multi_reduction <maximumf>, %252, %cst_109 [2] : vector<2x8x8xf32> to vector<2x8xf32>
    %254 = vector.shape_cast %253 : vector<2x8xf32> to vector<2x8x1xf32>
    %255 = vector.broadcast %254 : vector<2x8x1xf32> to vector<2x8x8xf32>
    %256 = arith.subf %252, %255 : vector<2x8x8xf32>
    %257 = math.exp %256 : vector<2x8x8xf32>
    %cst_110 = arith.constant dense<0.000000e+00> : vector<2x8xf32>
    %258 = vector.multi_reduction <add>, %257, %cst_110 [2] : vector<2x8x8xf32> to vector<2x8xf32>
    %259 = vector.shape_cast %258 : vector<2x8xf32> to vector<2x8x1xf32>
    %260 = tpu.reciprocal %259 {approx = true} : vector<2x8x1xf32> -> vector<2x8x1xf32>
    %261 = vector.broadcast %260 : vector<2x8x1xf32> to vector<2x8x8xf32>
    %262 = arith.mulf %257, %261 : vector<2x8x8xf32>
    "tpu.trace_start"() <{level = 10 : i32, message = "bqk,bkd->bqd"}> : () -> ()
    %cst_111 = arith.constant dense<0.000000e+00> : vector<2x8x8xf32>
    %263 = tpu.matmul %262, %249, %cst_111 {dimension_numbers = #tpu.dot_dimension_numbers<[2], [1], [1], [2], [0, 0, 0, 1, 1, 2], [0], [0]>} : vector<2x8x8xf32>, vector<2x8x8xf32>, vector<2x8x8xf32> -> vector<2x8x8xf32>
    "tpu.trace_stop"() : () -> ()
    %264 = vector.shape_cast %263 : vector<2x8x8xf32> to vector<16x8xf32>
    %265 = vector.extract_strided_slice %243 {offsets = [0, 8], sizes = [16, 8], strides = [1, 1]} : vector<16x96xf32> to vector<16x8xf32>
    %266 = vector.extract_strided_slice %243 {offsets = [0, 40], sizes = [16, 8], strides = [1, 1]} : vector<16x96xf32> to vector<16x8xf32>
    %267 = vector.extract_strided_slice %243 {offsets = [0, 72], sizes = [16, 8], strides = [1, 1]} : vector<16x96xf32> to vector<16x8xf32>
    %268 = vector.shape_cast %265 : vector<16x8xf32> to vector<2x8x8xf32>
    %269 = vector.shape_cast %266 : vector<16x8xf32> to vector<2x8x8xf32>
    %270 = vector.shape_cast %267 : vector<16x8xf32> to vector<2x8x8xf32>
    "tpu.trace_start"() <{level = 10 : i32, message = "bqd,bkd->bqk"}> : () -> ()
    %cst_112 = arith.constant dense<0.000000e+00> : vector<2x8x8xf32>
    %271 = tpu.matmul %268, %269, %cst_112 {dimension_numbers = #tpu.dot_dimension_numbers<[2], [2], [1], [1], [0, 0, 0, 1, 1, 1], [0], [0]>} : vector<2x8x8xf32>, vector<2x8x8xf32>, vector<2x8x8xf32> -> vector<2x8x8xf32>
    "tpu.trace_stop"() : () -> ()
    %272 = vector.broadcast %37 : vector<1x1x8xf32> to vector<2x8x8xf32>
    %273 = arith.addf %271, %272 : vector<2x8x8xf32>
    %cst_113 = arith.constant dense<0xFF800000> : vector<2x8xf32>
    %274 = vector.multi_reduction <maximumf>, %273, %cst_113 [2] : vector<2x8x8xf32> to vector<2x8xf32>
    %275 = vector.shape_cast %274 : vector<2x8xf32> to vector<2x8x1xf32>
    %276 = vector.broadcast %275 : vector<2x8x1xf32> to vector<2x8x8xf32>
    %277 = arith.subf %273, %276 : vector<2x8x8xf32>
    %278 = math.exp %277 : vector<2x8x8xf32>
    %cst_114 = arith.constant dense<0.000000e+00> : vector<2x8xf32>
    %279 = vector.multi_reduction <add>, %278, %cst_114 [2] : vector<2x8x8xf32> to vector<2x8xf32>
    %280 = vector.shape_cast %279 : vector<2x8xf32> to vector<2x8x1xf32>
    %281 = tpu.reciprocal %280 {approx = true} : vector<2x8x1xf32> -> vector<2x8x1xf32>
    %282 = vector.broadcast %281 : vector<2x8x1xf32> to vector<2x8x8xf32>
    %283 = arith.mulf %278, %282 : vector<2x8x8xf32>
    "tpu.trace_start"() <{level = 10 : i32, message = "bqk,bkd->bqd"}> : () -> ()
    %cst_115 = arith.constant dense<0.000000e+00> : vector<2x8x8xf32>
    %284 = tpu.matmul %283, %270, %cst_115 {dimension_numbers = #tpu.dot_dimension_numbers<[2], [1], [1], [2], [0, 0, 0, 1, 1, 2], [0], [0]>} : vector<2x8x8xf32>, vector<2x8x8xf32>, vector<2x8x8xf32> -> vector<2x8x8xf32>
    "tpu.trace_stop"() : () -> ()
    %285 = vector.shape_cast %284 : vector<2x8x8xf32> to vector<16x8xf32>
    %286 = vector.extract_strided_slice %243 {offsets = [0, 16], sizes = [16, 8], strides = [1, 1]} : vector<16x96xf32> to vector<16x8xf32>
    %287 = vector.extract_strided_slice %243 {offsets = [0, 48], sizes = [16, 8], strides = [1, 1]} : vector<16x96xf32> to vector<16x8xf32>
    %288 = vector.extract_strided_slice %243 {offsets = [0, 80], sizes = [16, 8], strides = [1, 1]} : vector<16x96xf32> to vector<16x8xf32>
    %289 = vector.shape_cast %286 : vector<16x8xf32> to vector<2x8x8xf32>
    %290 = vector.shape_cast %287 : vector<16x8xf32> to vector<2x8x8xf32>
    %291 = vector.shape_cast %288 : vector<16x8xf32> to vector<2x8x8xf32>
    "tpu.trace_start"() <{level = 10 : i32, message = "bqd,bkd->bqk"}> : () -> ()
    %cst_116 = arith.constant dense<0.000000e+00> : vector<2x8x8xf32>
    %292 = tpu.matmul %289, %290, %cst_116 {dimension_numbers = #tpu.dot_dimension_numbers<[2], [2], [1], [1], [0, 0, 0, 1, 1, 1], [0], [0]>} : vector<2x8x8xf32>, vector<2x8x8xf32>, vector<2x8x8xf32> -> vector<2x8x8xf32>
    "tpu.trace_stop"() : () -> ()
    %293 = vector.broadcast %37 : vector<1x1x8xf32> to vector<2x8x8xf32>
    %294 = arith.addf %292, %293 : vector<2x8x8xf32>
    %cst_117 = arith.constant dense<0xFF800000> : vector<2x8xf32>
    %295 = vector.multi_reduction <maximumf>, %294, %cst_117 [2] : vector<2x8x8xf32> to vector<2x8xf32>
    %296 = vector.shape_cast %295 : vector<2x8xf32> to vector<2x8x1xf32>
    %297 = vector.broadcast %296 : vector<2x8x1xf32> to vector<2x8x8xf32>
    %298 = arith.subf %294, %297 : vector<2x8x8xf32>
    %299 = math.exp %298 : vector<2x8x8xf32>
    %cst_118 = arith.constant dense<0.000000e+00> : vector<2x8xf32>
    %300 = vector.multi_reduction <add>, %299, %cst_118 [2] : vector<2x8x8xf32> to vector<2x8xf32>
    %301 = vector.shape_cast %300 : vector<2x8xf32> to vector<2x8x1xf32>
    %302 = tpu.reciprocal %301 {approx = true} : vector<2x8x1xf32> -> vector<2x8x1xf32>
    %303 = vector.broadcast %302 : vector<2x8x1xf32> to vector<2x8x8xf32>
    %304 = arith.mulf %299, %303 : vector<2x8x8xf32>
    "tpu.trace_start"() <{level = 10 : i32, message = "bqk,bkd->bqd"}> : () -> ()
    %cst_119 = arith.constant dense<0.000000e+00> : vector<2x8x8xf32>
    %305 = tpu.matmul %304, %291, %cst_119 {dimension_numbers = #tpu.dot_dimension_numbers<[2], [1], [1], [2], [0, 0, 0, 1, 1, 2], [0], [0]>} : vector<2x8x8xf32>, vector<2x8x8xf32>, vector<2x8x8xf32> -> vector<2x8x8xf32>
    "tpu.trace_stop"() : () -> ()
    %306 = vector.shape_cast %305 : vector<2x8x8xf32> to vector<16x8xf32>
    %307 = vector.extract_strided_slice %243 {offsets = [0, 24], sizes = [16, 8], strides = [1, 1]} : vector<16x96xf32> to vector<16x8xf32>
    %308 = vector.extract_strided_slice %243 {offsets = [0, 56], sizes = [16, 8], strides = [1, 1]} : vector<16x96xf32> to vector<16x8xf32>
    %309 = vector.extract_strided_slice %243 {offsets = [0, 88], sizes = [16, 8], strides = [1, 1]} : vector<16x96xf32> to vector<16x8xf32>
    %310 = vector.shape_cast %307 : vector<16x8xf32> to vector<2x8x8xf32>
    %311 = vector.shape_cast %308 : vector<16x8xf32> to vector<2x8x8xf32>
    %312 = vector.shape_cast %309 : vector<16x8xf32> to vector<2x8x8xf32>
    "tpu.trace_start"() <{level = 10 : i32, message = "bqd,bkd->bqk"}> : () -> ()
    %cst_120 = arith.constant dense<0.000000e+00> : vector<2x8x8xf32>
    %313 = tpu.matmul %310, %311, %cst_120 {dimension_numbers = #tpu.dot_dimension_numbers<[2], [2], [1], [1], [0, 0, 0, 1, 1, 1], [0], [0]>} : vector<2x8x8xf32>, vector<2x8x8xf32>, vector<2x8x8xf32> -> vector<2x8x8xf32>
    "tpu.trace_stop"() : () -> ()
    %314 = vector.broadcast %37 : vector<1x1x8xf32> to vector<2x8x8xf32>
    %315 = arith.addf %313, %314 : vector<2x8x8xf32>
    %cst_121 = arith.constant dense<0xFF800000> : vector<2x8xf32>
    %316 = vector.multi_reduction <maximumf>, %315, %cst_121 [2] : vector<2x8x8xf32> to vector<2x8xf32>
    %317 = vector.shape_cast %316 : vector<2x8xf32> to vector<2x8x1xf32>
    %318 = vector.broadcast %317 : vector<2x8x1xf32> to vector<2x8x8xf32>
    %319 = arith.subf %315, %318 : vector<2x8x8xf32>
    %320 = math.exp %319 : vector<2x8x8xf32>
    %cst_122 = arith.constant dense<0.000000e+00> : vector<2x8xf32>
    %321 = vector.multi_reduction <add>, %320, %cst_122 [2] : vector<2x8x8xf32> to vector<2x8xf32>
    %322 = vector.shape_cast %321 : vector<2x8xf32> to vector<2x8x1xf32>
    %323 = tpu.reciprocal %322 {approx = true} : vector<2x8x1xf32> -> vector<2x8x1xf32>
    %324 = vector.broadcast %323 : vector<2x8x1xf32> to vector<2x8x8xf32>
    %325 = arith.mulf %320, %324 : vector<2x8x8xf32>
    "tpu.trace_start"() <{level = 10 : i32, message = "bqk,bkd->bqd"}> : () -> ()
    %cst_123 = arith.constant dense<0.000000e+00> : vector<2x8x8xf32>
    %326 = tpu.matmul %325, %312, %cst_123 {dimension_numbers = #tpu.dot_dimension_numbers<[2], [1], [1], [2], [0, 0, 0, 1, 1, 2], [0], [0]>} : vector<2x8x8xf32>, vector<2x8x8xf32>, vector<2x8x8xf32> -> vector<2x8x8xf32>
    "tpu.trace_stop"() : () -> ()
    %327 = vector.shape_cast %326 : vector<2x8x8xf32> to vector<16x8xf32>
    %328 = tpu.concatenate %264, %285, %306, %327 in 1 : vector<16x8xf32>, vector<16x8xf32>, vector<16x8xf32>, vector<16x8xf32> -> vector<16x32xf32>
    %c1_124 = arith.constant 1 : index
    %c0_125 = arith.constant 0 : index
    %c0_126 = arith.constant 0 : index
    %329 = vector.load %arg9[%c1_124, %c0_125, %c0_126] : memref<2x32x32xf32, #tpu.memory_space<vmem>>, vector<1x32x32xf32>
    %330 = vector.shape_cast %329 : vector<1x32x32xf32> to vector<32x32xf32>
    %cst_127 = arith.constant dense<0.000000e+00> : vector<16x32xf32>
    %331 = tpu.matmul %328, %330, %cst_127 {dimension_numbers = #tpu.dot_dimension_numbers<[1], [0], [0], [1], [0, 0, 1, 1], [], []>} : vector<16x32xf32>, vector<32x32xf32>, vector<16x32xf32> -> vector<16x32xf32>
    %c1_128 = arith.constant 1 : index
    %c0_129 = arith.constant 0 : index
    %c0_130 = arith.constant 0 : index
    %332 = vector.load %arg10[%c1_128, %c0_129, %c0_130] : memref<2x1x32xf32, #tpu.memory_space<vmem>>, vector<1x1x32xf32>
    %333 = vector.shape_cast %332 : vector<1x1x32xf32> to vector<1x32xf32>
    %334 = vector.broadcast %333 : vector<1x32xf32> to vector<16x32xf32>
    %335 = arith.addf %331, %334 : vector<16x32xf32>
    %336 = arith.addf %212, %335 : vector<16x32xf32>
    %c1_131 = arith.constant 1 : index
    %c0_132 = arith.constant 0 : index
    %c0_133 = arith.constant 0 : index
    %337 = vector.load %arg11[%c1_131, %c0_132, %c0_133] : memref<2x1x32xf32, #tpu.memory_space<vmem>>, vector<1x1x32xf32>
    %338 = vector.shape_cast %337 : vector<1x1x32xf32> to vector<1x32xf32>
    %c1_134 = arith.constant 1 : index
    %c0_135 = arith.constant 0 : index
    %c0_136 = arith.constant 0 : index
    %339 = vector.load %arg12[%c1_134, %c0_135, %c0_136] : memref<2x1x32xf32, #tpu.memory_space<vmem>>, vector<1x1x32xf32>
    %340 = vector.shape_cast %339 : vector<1x1x32xf32> to vector<1x32xf32>
    %cst_137 = arith.constant dense<0.000000e+00> : vector<16xf32>
    %341 = vector.multi_reduction <add>, %336, %cst_137 [1] : vector<16x32xf32> to vector<16xf32>
    %342 = vector.shape_cast %341 : vector<16xf32> to vector<16x1xf32>
    %cst_138 = arith.constant 3.200000e+01 : f32
    %343 = vector.broadcast %cst_138 : f32 to vector<16x1xf32>
    %344 = arith.divf %342, %343 : vector<16x1xf32>
    %345 = vector.broadcast %344 : vector<16x1xf32> to vector<16x32xf32>
    %346 = arith.subf %336, %345 : vector<16x32xf32>
    %347 = arith.mulf %346, %346 : vector<16x32xf32>
    %cst_139 = arith.constant dense<0.000000e+00> : vector<16xf32>
    %348 = vector.multi_reduction <add>, %347, %cst_139 [1] : vector<16x32xf32> to vector<16xf32>
    %349 = vector.shape_cast %348 : vector<16xf32> to vector<16x1xf32>
    %cst_140 = arith.constant 3.200000e+01 : f32
    %350 = vector.broadcast %cst_140 : f32 to vector<16x1xf32>
    %351 = arith.divf %349, %350 : vector<16x1xf32>
    %cst_141 = arith.constant 9.99999974E-6 : f32
    %352 = vector.broadcast %cst_141 : f32 to vector<16x1xf32>
    %353 = arith.addf %351, %352 : vector<16x1xf32>
    %354 = math.rsqrt %353 : vector<16x1xf32>
    %355 = vector.broadcast %354 : vector<16x1xf32> to vector<16x32xf32>
    %356 = arith.mulf %346, %355 : vector<16x32xf32>
    %357 = vector.broadcast %338 : vector<1x32xf32> to vector<16x32xf32>
    %358 = arith.mulf %356, %357 : vector<16x32xf32>
    %359 = vector.broadcast %340 : vector<1x32xf32> to vector<16x32xf32>
    %360 = arith.addf %358, %359 : vector<16x32xf32>
    %c1_142 = arith.constant 1 : index
    %c0_143 = arith.constant 0 : index
    %c0_144 = arith.constant 0 : index
    %361 = vector.load %arg13[%c1_142, %c0_143, %c0_144] : memref<2x32x128xf32, #tpu.memory_space<vmem>>, vector<1x32x128xf32>
    %362 = vector.shape_cast %361 : vector<1x32x128xf32> to vector<32x128xf32>
    %cst_145 = arith.constant dense<0.000000e+00> : vector<16x128xf32>
    %363 = tpu.matmul %360, %362, %cst_145 {dimension_numbers = #tpu.dot_dimension_numbers<[1], [0], [0], [1], [0, 0, 1, 1], [], []>} : vector<16x32xf32>, vector<32x128xf32>, vector<16x128xf32> -> vector<16x128xf32>
    %c1_146 = arith.constant 1 : index
    %c0_147 = arith.constant 0 : index
    %c0_148 = arith.constant 0 : index
    %364 = vector.load %arg14[%c1_146, %c0_147, %c0_148] : memref<2x1x128xf32, #tpu.memory_space<vmem>>, vector<1x1x128xf32>
    %365 = vector.shape_cast %364 : vector<1x1x128xf32> to vector<1x128xf32>
    %366 = vector.broadcast %365 : vector<1x128xf32> to vector<16x128xf32>
    %367 = arith.addf %363, %366 : vector<16x128xf32>
    %cst_149 = arith.constant -1.702000e+00 : f32
    %368 = vector.broadcast %cst_149 : f32 to vector<16x128xf32>
    %369 = arith.mulf %368, %367 : vector<16x128xf32>
    %370 = math.exp %369 : vector<16x128xf32>
    %cst_150 = arith.constant 1.000000e+00 : f32
    %371 = vector.broadcast %cst_150 : f32 to vector<16x128xf32>
    %372 = arith.addf %371, %370 : vector<16x128xf32>
    %cst_151 = arith.constant 1.000000e+00 : f32
    %373 = vector.broadcast %cst_151 : f32 to vector<16x128xf32>
    %374 = arith.divf %373, %372 : vector<16x128xf32>
    %375 = arith.mulf %367, %374 : vector<16x128xf32>
    %c1_152 = arith.constant 1 : index
    %c0_153 = arith.constant 0 : index
    %c0_154 = arith.constant 0 : index
    %376 = vector.load %arg15[%c1_152, %c0_153, %c0_154] : memref<2x128x32xf32, #tpu.memory_space<vmem>>, vector<1x128x32xf32>
    %377 = vector.shape_cast %376 : vector<1x128x32xf32> to vector<128x32xf32>
    %cst_155 = arith.constant dense<0.000000e+00> : vector<16x32xf32>
    %378 = tpu.matmul %375, %377, %cst_155 {dimension_numbers = #tpu.dot_dimension_numbers<[1], [0], [0], [1], [0, 0, 1, 1], [], []>} : vector<16x128xf32>, vector<128x32xf32>, vector<16x32xf32> -> vector<16x32xf32>
    %c1_156 = arith.constant 1 : index
    %c0_157 = arith.constant 0 : index
    %c0_158 = arith.constant 0 : index
    %379 = vector.load %arg16[%c1_156, %c0_157, %c0_158] : memref<2x1x32xf32, #tpu.memory_space<vmem>>, vector<1x1x32xf32>
    %380 = vector.shape_cast %379 : vector<1x1x32xf32> to vector<1x32xf32>
    %381 = vector.broadcast %380 : vector<1x32xf32> to vector<16x32xf32>
    %382 = arith.addf %378, %381 : vector<16x32xf32>
    %383 = arith.addf %336, %382 : vector<16x32xf32>
    %384 = tpu.iota {dimensions = array<i32: 0>} : vector<2x16xi32>
    %385 = tpu.iota {dimensions = array<i32: 1>} : vector<2x16xi32>
    %c8_i32 = arith.constant 8 : i32
    %386 = vector.broadcast %c8_i32 : i32 to vector<2x16xi32>
    %387 = arith.muli %384, %386 : vector<2x16xi32>
    %388 = arith.cmpi eq, %385, %387 : vector<2x16xi32>
    %389 = arith.extui %388 : vector<2x16xi1> to vector<2x16xi32>
    %390 = arith.sitofp %389 : vector<2x16xi32> to vector<2x16xf32>
    %cst_159 = arith.constant dense<0.000000e+00> : vector<2x32xf32>
    %391 = tpu.matmul %390, %383, %cst_159 {dimension_numbers = #tpu.dot_dimension_numbers<[1], [0], [0], [1], [0, 0, 1, 1], [], []>} : vector<2x16xf32>, vector<16x32xf32>, vector<2x32xf32> -> vector<2x32xf32>
    %c0_160 = arith.constant 0 : index
    %c0_161 = arith.constant 0 : index
    %392 = vector.load %arg19[%c0_160, %c0_161] : memref<1x32xf32, #tpu.memory_space<vmem>>, vector<1x32xf32>
    %c0_162 = arith.constant 0 : index
    %c0_163 = arith.constant 0 : index
    %393 = vector.load %arg20[%c0_162, %c0_163] : memref<1x32xf32, #tpu.memory_space<vmem>>, vector<1x32xf32>
    %cst_164 = arith.constant dense<0.000000e+00> : vector<2xf32>
    %394 = vector.multi_reduction <add>, %391, %cst_164 [1] : vector<2x32xf32> to vector<2xf32>
    %395 = vector.shape_cast %394 : vector<2xf32> to vector<2x1xf32>
    %cst_165 = arith.constant 3.200000e+01 : f32
    %396 = vector.broadcast %cst_165 : f32 to vector<2x1xf32>
    %397 = arith.divf %395, %396 : vector<2x1xf32>
    %398 = vector.broadcast %397 : vector<2x1xf32> to vector<2x32xf32>
    %399 = arith.subf %391, %398 : vector<2x32xf32>
    %400 = arith.mulf %399, %399 : vector<2x32xf32>
    %cst_166 = arith.constant dense<0.000000e+00> : vector<2xf32>
    %401 = vector.multi_reduction <add>, %400, %cst_166 [1] : vector<2x32xf32> to vector<2xf32>
    %402 = vector.shape_cast %401 : vector<2xf32> to vector<2x1xf32>
    %cst_167 = arith.constant 3.200000e+01 : f32
    %403 = vector.broadcast %cst_167 : f32 to vector<2x1xf32>
    %404 = arith.divf %402, %403 : vector<2x1xf32>
    %cst_168 = arith.constant 9.99999974E-6 : f32
    %405 = vector.broadcast %cst_168 : f32 to vector<2x1xf32>
    %406 = arith.addf %404, %405 : vector<2x1xf32>
    %407 = math.rsqrt %406 : vector<2x1xf32>
    %408 = vector.broadcast %407 : vector<2x1xf32> to vector<2x32xf32>
    %409 = arith.mulf %399, %408 : vector<2x32xf32>
    %410 = vector.broadcast %392 : vector<1x32xf32> to vector<2x32xf32>
    %411 = arith.mulf %409, %410 : vector<2x32xf32>
    %412 = vector.broadcast %393 : vector<1x32xf32> to vector<2x32xf32>
    %413 = arith.addf %411, %412 : vector<2x32xf32>
    %c0_169 = arith.constant 0 : index
    %c0_170 = arith.constant 0 : index
    %414 = vector.load %arg21[%c0_169, %c0_170] : memref<32x16xf32, #tpu.memory_space<vmem>>, vector<32x16xf32>
    %cst_171 = arith.constant dense<0.000000e+00> : vector<2x16xf32>
    %415 = tpu.matmul %413, %414, %cst_171 {dimension_numbers = #tpu.dot_dimension_numbers<[1], [0], [0], [1], [0, 0, 1, 1], [], []>} : vector<2x32xf32>, vector<32x16xf32>, vector<2x16xf32> -> vector<2x16xf32>
    %416 = arith.mulf %415, %415 : vector<2x16xf32>
    %cst_172 = arith.constant dense<0.000000e+00> : vector<2xf32>
    %417 = vector.multi_reduction <add>, %416, %cst_172 [1] : vector<2x16xf32> to vector<2xf32>
    %418 = vector.shape_cast %417 : vector<2xf32> to vector<2x1xf32>
    %419 = math.rsqrt %418 : vector<2x1xf32>
    %420 = vector.broadcast %419 : vector<2x1xf32> to vector<2x16xf32>
    %421 = arith.mulf %415, %420 : vector<2x16xf32>
    %c0_173 = arith.constant 0 : index
    %c0_174 = arith.constant 0 : index
    %422 = vector.load %arg22[%c0_173, %c0_174] : memref<16x3xf32, #tpu.memory_space<vmem>>, vector<16x3xf32>
    %cst_175 = arith.constant dense<0.000000e+00> : vector<2x3xf32>
    %423 = tpu.matmul %421, %422, %cst_175 {dimension_numbers = #tpu.dot_dimension_numbers<[1], [0], [0], [1], [0, 0, 1, 1], [], []>} : vector<2x16xf32>, vector<16x3xf32>, vector<2x3xf32> -> vector<2x3xf32>
    %c0_176 = arith.constant 0 : index
    %c0_177 = arith.constant 0 : index
    %424 = memref.load %arg23[%c0_176, %c0_177] : memref<1x1xf32, #tpu.memory_space<smem>>
    %425 = vector.broadcast %424 : f32 to vector<2x3xf32>
    %426 = arith.mulf %425, %423 : vector<2x3xf32>
    %c0_178 = arith.constant 0 : index
    %c0_179 = arith.constant 0 : index
    %427 = vector.load %arg24[%c0_178, %c0_179] : memref<2x3xf32, #tpu.memory_space<vmem>>, vector<2x3xf32>
    tpu.vector_store %arg24[%c0_178, %c0_179], %426 {strides = array<i32>} : memref<2x3xf32, #tpu.memory_space<vmem>>, vector<2x3xf32>,
    return
  }
}

</mosaic_0001>

<bundles_post_ra>
// kernel: deep_prompt_clip_forward.1
= control target key start
LH: loop header
LB: loop body
LE: loop exit
PB: predicated region body
PF: predicated region fallthrough
CT: control target
= control target key end

     0   :  { %s6066_s0 = inlined_call_operand.vmem [shape: f32[16,192], index: 0, kind: input, shape index: {}]   ;;  %s6067_s1 = inlined_call_operand.vmem [shape: f32[192,32], index: 1, kind: input, shape index: {}]   ;;  %s6068_s2 = inlined_call_operand.vmem [shape: f32[16,32], index: 2, kind: input, shape index: {}]   ;;  %s6069_s3 = inlined_call_operand.vmem [shape: f32[1,32], index: 3, kind: input, shape index: {}]   ;;  %s6070_s4 = inlined_call_operand.vmem [shape: f32[1,32], index: 4, kind: input, shape index: {}]   ;;  %s6071_s5 = inlined_call_operand.vmem [shape: f32[2,1,32], index: 5, kind: input, shape index: {}]   ;;  %s6072_s6 = inlined_call_operand.vmem [shape: f32[2,1,32], index: 6, kind: input, shape index: {}]   ;;  %s6073_s7 = inlined_call_operand.vmem [shape: f32[2,32,96], index: 7, kind: input, shape index: {}]   ;;  %s6074_s8 = inlined_call_operand.vmem [shape: f32[2,1,96], index: 8, kind: input, shape index: {}]   ;;  %s6075_s9 = inlined_call_operand.vmem [shape: f32[2,32,32], index: 9, kind: input, shape index: {}]   ;;  %s6076_s10 = inlined_call_operand.vmem [shape: f32[2,1,32], index: 10, kind: input, shape index: {}]   ;;  %s6077_s11 = inlined_call_operand.vmem [shape: f32[2,1,32], index: 11, kind: input, shape index: {}]   ;;  %s6078_s12 = inlined_call_operand.vmem [shape: f32[2,1,32], index: 12, kind: input, shape index: {}]   ;;  %s6079_s13 = inlined_call_operand.vmem [shape: f32[2,32,128], index: 13, kind: input, shape index: {}]   ;;  %s6080_s14 = inlined_call_operand.vmem [shape: f32[2,1,128], index: 14, kind: input, shape index: {}]   ;;  %s6081_s15 = inlined_call_operand.vmem [shape: f32[2,128,32], index: 15, kind: input, shape index: {}]   ;;  %s6082_s16 = inlined_call_operand.vmem [shape: f32[2,1,32], index: 16, kind: input, shape index: {}]   ;;  %s6083_s17 = inlined_call_operand.vmem [shape: f32[16,32], index: 17, kind: input, shape index: {}]   ;;  %s6084_s18 = inlined_call_operand.vmem [shape: f32[16,32], index: 18, kind: input, shape index: {}]   ;;  %s6085_s19 = inlined_call_operand.vmem [shape: f32[1,32], index: 19, kind: input, shape index: {}]   ;;  %s6086_s20 = inlined_call_operand.vmem [shape: f32[1,32], index: 20, kind: input, shape index: {}]   ;;  %s6087_s21 = inlined_call_operand.vmem [shape: f32[32,16], index: 21, kind: input, shape index: {}]   ;;  %s6088_s22 = inlined_call_operand.vmem [shape: f32[16,3], index: 22, kind: input, shape index: {}]   ;;  %s6089_s23 = inlined_call_operand.<no memory space> [shape: f32[1,1], index: 23, kind: input, shape index: {}]   ;;  %s6090_s24 = inlined_call_operand.hbm [shape: f32[2,3], index: 24, kind: output, shape index: {}]  }
   0x1   :  { %6120 = sst [smem:[#allocation6_spill]] %s6066_s0 }
   0x2   :  { %6121 = sst [smem:[#allocation7_spill]] %s6067_s1 }
   0x3   :  { %6122 = sst [smem:[#allocation8_spill]] %s6068_s2 }
   0x4   :  { %6123 = sst [smem:[#allocation9_spill]] %s6069_s3 }
   0x5   :  { %6124 = sst [smem:[#allocation10_spill]] %s6070_s4 }
   0x6   :  { %6125 = sst [smem:[#allocation11_spill]] %s6071_s5 }
   0x7   :  { %6126 = sst [smem:[#allocation12_spill]] %s6072_s6 }
   0x8   :  { %6127 = sst [smem:[#allocation13_spill]] %s6073_s7 }
   0x9   :  { %6128 = sst [smem:[#allocation14_spill]] %s6074_s8 }
   0xa   :  { %s6129_s27 = sld [smem:[#allocation7_spill]]  ;;  %v5106_v3 = vmov 0.0|0.0   ;;  %vm109_vm0 = vcmask 523264   ;;  %s6130_s2 = sld [smem:[#allocation6_spill]] }
   0xb   :  { %4799 = vmatprep.subr.bf16.mxu0 %v5106_v3 }
  0x10   :  { %v83_v0 = vld [vmem:[%s6129_s27] sm:$0xff]  ;;  %v84_v1 = vld [vmem:[%s6129_s27 + $0x8] sm:$0xff]  ;;  %v85_v2 = vld [vmem:[%s6129_s27 + $0x10] sm:$0xff] }
  0x11   :  { %v4800_v4 = vpack.c.bf16 %v84_v1, %v83_v0  ;;  %v86_v5 = vld [vmem:[%s6129_s27 + $0x18] sm:$0xff]  ;;  %v87_v7 = vld [vmem:[%s6129_s27 + $0x20] sm:$0xff]  ;;  %v88_v8 = vld [vmem:[%s6129_s27 + $0x28] sm:$0xff] }
  0x12   :  { %v4803_v6 = vpack.c.bf16 %v86_v5, %v85_v2  ;;  %v4806_v9 = vpack.c.bf16 %v88_v8, %v87_v7  ;;  %v89_v10 = vld [vmem:[%s6129_s27 + $0x30] sm:$0xff]  ;;  %v90_v11 = vld [vmem:[%s6129_s27 + $0x38] sm:$0xff]  ;;  %v80_v12 = vld [vmem:[%s6130_s2 + $0x8] sm:$0xff] }
  0x13   :  { %4801 = vmatpush1.bf16.msra.mxu0 %v4800_v4  ;;  %4209 = vmatprep.mubr.msk.f32.mxu0 %vm109_vm0, %v80_v12 }
  0x14   :  { %4802 = vmatprep.subr.bf16.mxu0 %v5106_v3 }
  0x17   :  { %4804 = vmatpush1.bf16.msra.mxu0 %v4803_v6 }
  0x18   :  { %4805 = vmatprep.subr.bf16.mxu0 %v5106_v3 }
  0x19   :  { %30 = vsyncpa [#allocation4], 0  ;;  %v4809_v13 = vpack.c.bf16 %v90_v11, %v89_v10  ;;  %v91_v14 = vld [vmem:[%s6129_s27 + $0x40] sm:$0xff]  ;;  %v92_v15 = vld [vmem:[%s6129_s27 + $0x48] sm:$0xff]  ;;  %s6131_s29 = sld [smem:[#allocation8_spill]]  ;;  %vm193_vm1 = vcmask 261120  }
  0x1a   :  { %v4812_v16 = vpack.c.bf16 %v92_v15, %v91_v14  ;;  %v93_v17 = vld [vmem:[%s6129_s27 + $0x50] sm:$0xff]  ;;  %v94_v18 = vld [vmem:[%s6129_s27 + $0x58] sm:$0xff]  ;;  %v95_v20 = vld [vmem:[%s6129_s27 + $0x60] sm:$0xff]  ;;  %s6132_s3 = sld [smem:[#allocation9_spill]]  ;;  %s6133_s4 = sld [smem:[#allocation10_spill]]  ;;  %vm5108_vm2 = vmmov 0  }
  0x1b   :  { %4807 = vmatpush1.bf16.msra.mxu0 %v4806_v9  ;;  %v4815_v19 = vpack.c.bf16 %v94_v18, %v93_v17  ;;  %v96_v21 = vld [vmem:[%s6129_s27 + $0x68] sm:$0xff]  ;;  %v97_v23 = vld [vmem:[%s6129_s27 + $0x70] sm:$0xff]  ;;  %v98_v24 = vld [vmem:[%s6129_s27 + $0x78] sm:$0xff]  ;;  %s6134_s26 = sld [smem:[#allocation13_spill]]  ;;  %s6137_s28 = sld [smem:[#allocation14_spill]]  ;;  %vm382_vm3 = vcmask 64512  }
  0x1c   :  { %4808 = vmatprep.subr.bf16.mxu0 %v5106_v3  ;;  %v4818_v22 = vpack.c.bf16 %v96_v21, %v95_v20  ;;  %v4821_v25 = vpack.c.bf16 %v98_v24, %v97_v23  ;;  %v99_v26 = vld [vmem:[%s6129_s27 + $0x80] sm:$0xff]  ;;  %v100_v27 = vld [vmem:[%s6129_s27 + $0x88] sm:$0xff]  ;;  %v101_v29 = vld [vmem:[%s6129_s27 + $0x90] sm:$0xff]  ;;  %s5111_s6 = smov 64   ;;  %s6116_s0 = smov 120   ;;  %vm1727_vm5 = vcmask 195584  }
  0x1d   :  { %v4824_v28 = vpack.c.bf16 %v100_v27, %v99_v26  ;;  %v102_v30 = vld [vmem:[%s6129_s27 + $0x98] sm:$0xff]  ;;  %v103_v32 = vld [vmem:[%s6129_s27 + $0xa0] sm:$0xff]  ;;  %v104_v33 = vld [vmem:[%s6129_s27 + $0xa8] sm:$0xff]  ;;  %s6114_s7 = smov 56   ;;  %s6110_s30 = smov 112   ;;  %vm1724_vm6 = vcmask 130048  }
  0x1e   :  { %v4827_v31 = vpack.c.bf16 %v102_v30, %v101_v29  ;;  %v4830_v34 = vpack.c.bf16 %v104_v33, %v103_v32  ;;  %v105_v35 = vld [vmem:[%s6129_s27 + $0xb0] sm:$0xff]  ;;  %v106_v36 = vld [vmem:[%s6129_s27 + $0xb8] sm:$0xff]  ;;  %v79_v38 = vld [vmem:[%s6130_s2] sm:$0xff]  ;;  %s5109_s27 = smov 96   ;;  %s6104_s25 = smov 48   ;;  %vm4003_vm9 = vcmask 254976  }
  0x1f   :  { %4810 = vmatpush1.bf16.msra.mxu0 %v4809_v13  ;;  %v4833_v37 = vpack.c.bf16 %v106_v36, %v105_v35  ;;  %v82_v39 = vld [vmem:[%s6130_s2 + $0x18] sm:$0xff]  ;;  %v81_v40 = vld [vmem:[%s6130_s2 + $0x10] sm:$0xff]  ;;  %v107_v41 = vld [vmem:[%s6131_s29] sm:$0xff]  ;;  %s6112_s2 = smov 80   ;;  %s6100_s8 = smov 72   ;;  %vm4109_vm10 = vcmask 123904  }
  0x20   :  { %4811 = vmatprep.subr.bf16.mxu0 %v5106_v3  ;;  %v108_v45 = vld [vmem:[%s6131_s29 + $0x8] sm:$0xff]  ;;  %v4211_v5 = vld [vmem:[%s6132_s3] ss:$0 sm:$0xff]  ;;  %s6135_s3 = sld [smem:[#allocation11_spill]]  ;;  %s5112_s29 = smov 88   ;;  %vm4193_vm11 = vcmask 17408  }
  0x21   :  { %v4212_v7 = vld [vmem:[%s6133_s4] ss:$0 sm:$0xff]  ;;  %v288_v27 = vld [vmem:[%s6134_s26 + $0x8] sm:$0xff]  ;;  %v290_v30 = vld [vmem:[%s6134_s26 + $0x18] sm:$0xff]  ;;  %s6136_s4 = sld [smem:[#allocation12_spill]]  ;;  %s6098_s1 = smov 104  }
  0x22   :  { %v287_v26 = vld [vmem:[%s6134_s26] sm:$0xff]  ;;  %s6106_s5 = smov 40  }
  0x23   :  { %4813 = vmatpush1.bf16.msra.mxu0 %v4812_v16  ;;  %v4835_v29 = vpack.c.bf16 %v288_v27, %v287_v26 }
  0x24   :  { %4814 = vmatprep.subr.bf16.mxu0 %v5106_v3 }
  0x27   :  { %4816 = vmatpush1.bf16.msra.mxu0 %v4815_v19 }
  0x28   :  { %4817 = vmatprep.subr.bf16.mxu0 %v5106_v3 }
  0x2b   :  { %4819 = vmatpush1.bf16.msra.mxu0 %v4818_v22 }
  0x2c   :  { %4820 = vmatprep.subr.bf16.mxu0 %v5106_v3 }
  0x2f   :  { %4822 = vmatpush1.bf16.msra.mxu0 %v4821_v25 }
  0x30   :  { %4823 = vmatprep.subr.bf16.mxu0 %v5106_v3 }
  0x33   :  { %4825 = vmatpush1.bf16.msra.mxu0 %v4824_v28  ;;  %v289_v28 = vld [vmem:[%s6134_s26 + $0x10] sm:$0xff] }
  0x34   :  { %4826 = vmatprep.subr.bf16.mxu0 %v5106_v3 }
  0x37   :  { %4828 = vmatpush1.bf16.msra.mxu0 %v4827_v31  ;;  %v4839_v31 = vpack.c.bf16 %v290_v30, %v289_v28 }
  0x38   :  { %4829 = vmatprep.subr.bf16.mxu0 %v5106_v3 }
  0x3b   :  { %4831 = vmatpush1.bf16.msra.mxu0 %v4830_v34 }
  0x3c   :  { %4832 = vmatprep.subr.bf16.mxu0 %v5106_v3 }
  0x3f   :  { %4834 = vmatpush1.bf16.msra.mxu0 %v4833_v37 }
  0x40   :  { %4836 = vmatprep.subr.bf16.mxu0 %v4835_v29 }
  0x42   :  { %181 = vmatmul.mubr.f32.vlgmr.msra.gmra.mrb[0].mxu0 %v79_v38 }
  0x43   :  { %4210 = vmatprep.mubr.msk.f32.mxu0 %vm109_vm0, %v82_v39  ;;  %4838 = vmatpush3.bf16.msra.mxu0 %v4835_v29  ;;  %v4213_v39 = vld [vmem:[%s6135_s3] ss:$0 sm:$0xff] }
  0x44   :  { %4840 = vmatprep.subr.bf16.mxu0 %v4839_v31 }
  0x46   :  { %186 = vmatmul.mubr.f32.gmra.mrb[2].mxu0 %v81_v40 }
  0x47   :  { %4842 = vmatpush3.bf16.msra.mxu0 %v4839_v31 }
 0x115   :  { %v182_v42 = vpop.f32.mrb[0].mxu0 }
 0x116   :  { %v183_v43 = vadd.f32 %v182_v42, %v107_v41  ;;  %v184_v44 = vpop.f32.mrb[1].mxu0  ;;  %v4214_v41 = vld [vmem:[%s6136_s4] ss:$0 sm:$0xff] }
 0x118   :  { %v194_v46 = vsel %vm193_vm1, %v183_v43, 0.0 }
 0x119   :  { %v187_v47 = vpop.f32.mrb[2].mxu0  ;;  %195 = vadd.xlane.f32.xlu0 %v194_v46 }
 0x11a   :  { %v188_v48 = vadd.f32 %v187_v47, %v108_v45  ;;  %v189_v49 = vpop.f32.mrb[3].mxu0 }
 0x11b   :  { %v4215_v49 = vld [vmem:[%s6137_s28] ss:$0 sm:$0xff] }
 0x11c   :  { %v197_v50 = vsel %vm193_vm1, %v188_v48, 0.0 }
 0x11d   :  { %198 = vadd.xlane.f32.xlu0 %v197_v50 }
 0x1a6   :  { %v196_v51 = vpop.xlane.xlu0 %195 }
 0x1a7   :  { %v201_v52 = vmul.f32 0.03125, %v196_v51 }
 0x1a9   :  { %v203_v53 = vsub.f32 %v183_v43, %v201_v52 }
 0x1aa   :  { %v199_v54 = vpop.xlane.xlu0 %198 }
 0x1ab   :  { %v202_v55 = vmul.f32 0.03125, %v199_v54  ;;  %v205_v56 = vmul.f32 %v203_v53, %v203_v53 }
 0x1ad   :  { %v204_v57 = vsub.f32 %v188_v48, %v202_v55  ;;  %v207_v58 = vsel %vm193_vm1, %v205_v56, 0.0  ;;  %v5107_v48 = vmov 0.0   ;;  %v237_v56 = vlaneseq }
 0x1ae   :  { %208 = vadd.xlane.f32.xlu1 %v207_v58  ;;  %4489 = vmatprep.subr.mxu1 %v5107_v48  ;;  %v5110_v58 = vmov -1e+30  }
 0x1af   :  { %v206_v59 = vmul.f32 %v204_v57, %v204_v57  ;;  %4544 = vmatprep.subr.mxu0 %v5107_v48  ;;  %4491 = vmatprep.mubr.msk.f32.mxu1 %vm5108_vm2, %v5107_v48 }
 0x1b1   :  { %v210_v60 = vsel %vm193_vm1, %v206_v59, 0.0 }
 0x1b2   :  { %211 = vadd.xlane.f32.xlu1 %v210_v60 }
 0x23b   :  { %v209_v61 = vpop.xlane.xlu1 %208 }
 0x23c   :  { %v213_v62 = vmul.f32 0.03125, %v209_v61 }
 0x23e   :  { %v215_v63 = vadd.f32 1e-05, %v213_v62 }
 0x23f   :  { %v212_v0 = vpop.xlane.xlu1 %211 }
 0x240   :  { %4978 = vrsqrt.f32 %v215_v63  ;;  %v214_v1 = vmul.f32 0.03125, %v212_v0 }
 0x242   :  { %v216_v2 = vadd.f32 1e-05, %v214_v1 }
 0x244   :  { %4980 = vrsqrt.f32 %v216_v2 }
 0x24a   :  { %v4979_v4 = vpop.eup %4978 }
 0x24b   :  { %v219_v6 = vmul.f32 %v4979_v4, %v203_v53 }
 0x24d   :  { %v227_v8 = vmul.f32 %v4211_v5, %v219_v6 }
 0x24e   :  { %v4981_v9 = vpop.eup %4980 }
 0x24f   :  { %v5364_v10 = vadd.f32 %v4212_v7, %v227_v8  ;;  %v220_v11 = vmul.f32 %v4981_v9, %v204_v57  ;;  %v5426_v57 = vand.u32 127, %v237_v56 }
 0x251   :  { %v245_v12 = vsel %vm193_vm1, %v5364_v10, 0.0  ;;  %v228_v13 = vmul.f32 %v4211_v5, %v220_v11  ;;  %vm239_vm4 = vcmp.lt.s32.totalorder %v5426_v57, 5  ;;  %vm241_vm7 = vcmp.lt.s32.totalorder %v5426_v57, 7 }
 0x252   :  { %246 = vadd.xlane.f32.xlu0 %v245_v12  ;;  %v5430_v59 = vsel %vm239_vm4, 0.0, %v5110_v58 }
 0x253   :  { %v5368_v14 = vadd.f32 %v4212_v7, %v228_v13 }
 0x255   :  { %v248_v15 = vsel %vm193_vm1, %v5368_v14, 0.0 }
 0x256   :  { %249 = vadd.xlane.f32.xlu1 %v248_v15 }
 0x2df   :  { %v247_v16 = vpop.xlane.xlu0 %246 }
 0x2e0   :  { %v251_v17 = vmul.f32 0.03125, %v247_v16 }
 0x2e2   :  { %v253_v18 = vsub.f32 %v5364_v10, %v251_v17 }
 0x2e3   :  { %v250_v19 = vpop.xlane.xlu1 %249 }
 0x2e4   :  { %v252_v20 = vmul.f32 0.03125, %v250_v19  ;;  %v255_v21 = vmul.f32 %v253_v18, %v253_v18 }
 0x2e6   :  { %v254_v22 = vsub.f32 %v5368_v14, %v252_v20  ;;  %v257_v23 = vsel %vm193_vm1, %v255_v21, 0.0 }
 0x2e7   :  { %258 = vadd.xlane.f32.xlu0 %v257_v23 }
 0x2e8   :  { %v256_v24 = vmul.f32 %v254_v22, %v254_v22 }
 0x2ea   :  { %v260_v25 = vsel %vm193_vm1, %v256_v24, 0.0 }
 0x2eb   :  { %261 = vadd.xlane.f32.xlu1 %v260_v25 }
 0x374   :  { %v259_v32 = vpop.xlane.xlu0 %258 }
 0x375   :  { %v263_v33 = vmul.f32 0.03125, %v259_v32 }
 0x377   :  { %v265_v34 = vadd.f32 1e-05, %v263_v33 }
 0x378   :  { %v262_v35 = vpop.xlane.xlu1 %261 }
 0x379   :  { %4982 = vrsqrt.f32 %v265_v34  ;;  %v264_v36 = vmul.f32 0.03125, %v262_v35 }
 0x37b   :  { %v266_v37 = vadd.f32 1e-05, %v264_v36 }
 0x37d   :  { %4984 = vrsqrt.f32 %v266_v37 }
 0x383   :  { %v4983_v38 = vpop.eup %4982 }
 0x384   :  { %v269_v40 = vmul.f32 %v4983_v38, %v253_v18 }
 0x386   :  { %v277_v42 = vmul.f32 %v4213_v39, %v269_v40 }
 0x387   :  { %v4985_v43 = vpop.eup %4984 }
 0x388   :  { %v270_v44 = vmul.f32 %v4985_v43, %v254_v22  ;;  %v285_v45 = vadd.f32 %v4214_v41, %v277_v42 }
 0x38a   :  { %v278_v46 = vmul.f32 %v4213_v39, %v270_v44  ;;  %4486 = vmatprep.mubr.msk.f32.mxu0 %vm193_vm1, %v285_v45 }
 0x38c   :  { %v286_v47 = vadd.f32 %v4214_v41, %v278_v46 }
 0x38e   :  { %4487 = vmatmul.mubr.msk.f32.vlgmr.msra.gmra.mrb[4].mxu0 %vm193_vm1, %v286_v47 }
 0x38f   :  { %4546 = vmatprep.mubr.msk.f32.mxu0 %vm5108_vm2, %v5107_v48 }
 0x461   :  { %v4488_v50 = vpop.f32.mrb[4].mxu0 }
 0x462   :  { %v5405_v51 = vadd.f32 %v4488_v50, %v4215_v49  ;;  %v370_v52 = vpop.f32.mrb[5].mxu0 }
 0x463   :  { %v5407_v53 = vadd.f32 %v4215_v49, %v370_v52 }
 0x464   :  { %458 = vrot.lane.b32.xlu1 %v5405_v51, %s5109_s27 }
 0x465   :  { %380 = vrot.lane.b32.xlu0 %v5407_v53, %s5109_s27 }
 0x4d6   :  { %v459_v55 = vpop.permute.xlu1 %458 }
 0x4d7   :  { %v381_v54 = vpop.permute.xlu0 %380 }
 0x4d8   :  { %4490 = vmatpush3.xpose.msk.msra.mxu1 %vm382_vm3, %v381_v54 }
 0x4d9   :  { %4494 = vmatprep.subr.mxu1 %v5107_v48 }
 0x4db   :  { %4492 = vmatmul.mubr.msk.f32.vlgmr.msra.gmra.mrb[0].mxu1 %vm382_vm3, %v5407_v53 }
 0x4dc   :  { %4495 = vmatpush3.xpose.msk.msra.mxu1 %vm382_vm3, %v459_v55  ;;  %4496 = vmatprep.mubr.msk.f32.mxu1 %vm5108_vm2, %v5107_v48 }
 0x4dd   :  { %4499 = vmatprep.subr.mxu1 %v5107_v48 }
 0x4df   :  { %4497 = vmatmul.mubr.msk.f32.vlgmr.msra.gmra.mrb[2].mxu1 %vm382_vm3, %v5405_v51 }
 0x4e0   :  { %4501 = vmatprep.mubr.msk.f32.mxu1 %vm5108_vm2, %v5107_v48 }
 0x5ae   :  { %v453_v60 = vpop.f32.mrb[0].mxu1 }
 0x5af   :  { %v454_v61 = vadd.f32 %v453_v60, %v5430_v59  ;;  %v4493_v62 = vpop.f32.mrb[1].mxu1 }
 0x5b1   :  { %v534_v63 = vsel %vm382_vm3, %v454_v61, -inf }
 0x5b2   :  { %535 = vmax.xlane.f32.xlu1 %v534_v63  ;;  %v530_v0 = vpop.f32.mrb[2].mxu1 }
 0x5b3   :  { %v531_v1 = vadd.f32 %v530_v0, %v5430_v59  ;;  %v4498_v2 = vpop.f32.mrb[3].mxu1 }
 0x5b5   :  { %v537_v4 = vsel %vm382_vm3, %v531_v1, -inf }
 0x5b6   :  { %538 = vmax.xlane.f32.xlu0 %v537_v4 }
 0x5c3   :  { %632 = vrot.lane.b32.xlu1 %v5405_v51, %s5111_s6 }
 0x5c7   :  { %710 = vrot.lane.b32.xlu1 %v5407_v53, %s5112_s29 }
 0x63f   :  { %v536_v5 = vpop.xlane.xlu1 %535 }
 0x640   :  { %v540_v6 = vsub.f32 %v454_v61, %v536_v5 }
 0x642   :  { %v542_v7 = vmul.f32 1.442695, %v540_v6 }
 0x643   :  { %v539_v8 = vpop.xlane.xlu0 %538  ;;  %v633_v17 = vpop.permute.xlu1 %632 }
 0x644   :  { %4986 = vpow2.f32 %v542_v7  ;;  %v541_v9 = vsub.f32 %v531_v1, %v539_v8 }
 0x646   :  { %v544_v11 = vmul.f32 1.442695, %v541_v9 }
 0x647   :  { %v711_v18 = vpop.permute.xlu1 %710 }
 0x648   :  { %4988 = vpow2.f32 %v544_v11 }
 0x64e   :  { %v4987_v12 = vpop.eup %4986 }
 0x64f   :  { %v546_v13 = vsel %vm382_vm3, %v4987_v12, 0.0 }
 0x650   :  { %547 = vadd.xlane.f32.xlu0 %v546_v13 }
 0x652   :  { %v4989_v15 = vpop.eup %4988 }
 0x653   :  { %v549_v16 = vsel %vm382_vm3, %v4989_v15, 0.0 }
 0x654   :  { %550 = vadd.xlane.f32.xlu1 %v549_v16 }
 0x665   :  { %708 = vrot.lane.b32.xlu1 %v5407_v53, %s6116_s0 }
 0x666   :  { %556 = vrot.lane.b32.xlu0 %v5407_v53, %s5111_s6 }
 0x669   :  { %786 = vrot.lane.b32.xlu1 %v5405_v51, %s6116_s0 }
 0x66a   :  { %788 = vrot.lane.b32.xlu0 %v5405_v51, %s5112_s29 }
 0x6dd   :  { %v548_v19 = vpop.xlane.xlu0 %547 }
 0x6de   :  { %4990 = vrcp.f32 %v548_v19 }
 0x6e1   :  { %v551_v20 = vpop.xlane.xlu1 %550  ;;  %v557_v21 = vpop.permute.xlu0 %556 }
 0x6e2   :  { %4992 = vrcp.f32 %v551_v20  ;;  %4500 = vmatpush3.msra.mxu1 %v557_v21 }
 0x6e3   :  { %4504 = vmatprep.subr.mxu1 %v5107_v48 }
 0x6e5   :  { %v709_v26 = vpop.permute.xlu1 %708  ;;  %v789_v27 = vpop.permute.xlu0 %788 }
 0x6e8   :  { %v4991_v22 = vpop.eup %4990 }
 0x6e9   :  { %v554_v23 = vmul.f32 %v4991_v22, %v4987_v12  ;;  %v787_v28 = vpop.permute.xlu1 %786 }
 0x6eb   :  { %4502 = vmatmul.mubr.msk.f32.vlgmr.msra.gmra.mrb[4].mxu1 %vm382_vm3, %v554_v23 }
 0x6ec   :  { %v4993_v24 = vpop.eup %4992  ;;  %4505 = vmatpush3.msra.mxu1 %v633_v17  ;;  %4506 = vmatprep.mubr.msk.f32.mxu1 %vm5108_vm2, %v5107_v48 }
 0x6ed   :  { %v555_v25 = vmul.f32 %v4993_v24, %v4989_v15  ;;  %4509 = vmatprep.subr.mxu1 %v5107_v48 }
 0x6ef   :  { %4507 = vmatmul.mubr.msk.f32.vlgmr.msra.gmra.mrb[6].mxu1 %vm382_vm3, %v555_v25 }
 0x6f0   :  { %4511 = vmatprep.mubr.msk.f32.mxu1 %vm5108_vm2, %v5107_v48 }
 0x6f3   :  { %4510 = vmatpush3.xpose.msk.msra.mxu1 %vm382_vm3, %v711_v18 }
 0x6f4   :  { %4514 = vmatprep.subr.mxu1 %v5107_v48 }
 0x6f6   :  { %4512 = vmatmul.mubr.msk.f32.vlgmr.msra.gmra.mrb[8].mxu1 %vm382_vm3, %v709_v26 }
 0x6f7   :  { %4515 = vmatpush3.xpose.msk.msra.mxu1 %vm382_vm3, %v789_v27  ;;  %4516 = vmatprep.mubr.msk.f32.mxu1 %vm5108_vm2, %v5107_v48 }
 0x6f8   :  { %4519 = vmatprep.subr.mxu1 %v5107_v48 }
 0x6fa   :  { %4517 = vmatmul.mubr.msk.f32.vlgmr.msra.gmra.mrb[10].mxu1 %vm382_vm3, %v787_v28 }
 0x6fb   :  { %4521 = vmatprep.mubr.msk.f32.mxu1 %vm5108_vm2, %v5107_v48 }
 0x7be   :  { %v5468_v29 = vpop.f32.mrb[4].mxu1 }
 0x7bf   :  { %v4503_v30 = vpop.f32.mrb[5].mxu1 }
 0x7c2   :  { %v5470_v31 = vpop.f32.mrb[6].mxu1 }
 0x7c3   :  { %v4508_v32 = vpop.f32.mrb[7].mxu1 }
 0x7c9   :  { %v782_v33 = vpop.f32.mrb[8].mxu1 }
 0x7ca   :  { %v783_v34 = vadd.f32 %v782_v33, %v5430_v59  ;;  %v4513_v35 = vpop.f32.mrb[9].mxu1 }
 0x7cc   :  { %v864_v36 = vsel %vm382_vm3, %v783_v34, -inf }
 0x7cd   :  { %865 = vmax.xlane.f32.xlu0 %v864_v36  ;;  %v860_v37 = vpop.f32.mrb[10].mxu1 }
 0x7ce   :  { %v861_v38 = vadd.f32 %v860_v37, %v5430_v59  ;;  %v4518_v39 = vpop.f32.mrb[11].mxu1 }
 0x7d0   :  { %v867_v40 = vsel %vm382_vm3, %v861_v38, -inf }
 0x7d1   :  { %868 = vmax.xlane.f32.xlu1 %v867_v40 }
 0x7e2   :  { %962 = vrot.lane.b32.xlu1 %v5405_v51, %s6114_s7 }
 0x7e6   :  { %1040 = vrot.lane.b32.xlu1 %v5407_v53, %s6112_s2 }
 0x7ea   :  { %1038 = vrot.lane.b32.xlu1 %v5407_v53, %s6110_s30 }
 0x7ee   :  { %1116 = vrot.lane.b32.xlu1 %v5405_v51, %s6110_s30  ;;  %s6144_s30 = smov 104  }
 0x85a   :  { %v866_v41 = vpop.xlane.xlu0 %865 }
 0x85b   :  { %v870_v42 = vsub.f32 %v783_v34, %v866_v41 }
 0x85d   :  { %v872_v43 = vmul.f32 1.442695, %v870_v42 }
 0x85e   :  { %v869_v44 = vpop.xlane.xlu1 %868 }
 0x85f   :  { %4994 = vpow2.f32 %v872_v43  ;;  %v871_v45 = vsub.f32 %v861_v38, %v869_v44 }
 0x861   :  { %v874_v46 = vmul.f32 1.442695, %v871_v45 }
 0x862   :  { %v963_v61 = vpop.permute.xlu1 %962 }
 0x863   :  { %4996 = vpow2.f32 %v874_v46 }
 0x866   :  { %v1041_v1 = vpop.permute.xlu1 %1040 }
 0x869   :  { %v4995_v47 = vpop.eup %4994 }
 0x86a   :  { %v876_v49 = vsel %vm382_vm3, %v4995_v47, 0.0  ;;  %v1039_v4 = vpop.permute.xlu1 %1038 }
 0x86b   :  { %877 = vadd.xlane.f32.xlu0 %v876_v49 }
 0x86d   :  { %v4997_v50 = vpop.eup %4996 }
 0x86e   :  { %v879_v52 = vsel %vm382_vm3, %v4997_v50, 0.0  ;;  %v1117_v6 = vpop.permute.xlu1 %1116 }
 0x86f   :  { %880 = vadd.xlane.f32.xlu0 %v879_v52 }
 0x885   :  { %886 = vrot.lane.b32.xlu0 %v5407_v53, %s6114_s7 }
 0x889   :  { %1118 = vrot.lane.b32.xlu0 %v5405_v51, %s6112_s2  ;;  %s6143_s2 = smov 72  }
 0x8f8   :  { %v878_v54 = vpop.xlane.xlu0 %877 }
 0x8f9   :  { %4998 = vrcp.f32 %v878_v54 }
 0x8fc   :  { %v881_v55 = vpop.xlane.xlu0 %880 }
 0x8fd   :  { %5000 = vrcp.f32 %v881_v55 }
 0x900   :  { %v887_v60 = vpop.permute.xlu0 %886 }
 0x901   :  { %4520 = vmatpush3.msra.mxu1 %v887_v60 }
 0x902   :  { %4524 = vmatprep.subr.mxu1 %v5107_v48 }
 0x903   :  { %v4999_v62 = vpop.eup %4998 }
 0x904   :  { %v884_v63 = vmul.f32 %v4999_v62, %v4995_v47  ;;  %v1119_v5 = vpop.permute.xlu0 %1118 }
 0x906   :  { %4522 = vmatmul.mubr.msk.f32.vlgmr.msra.gmra.mrb[12].mxu1 %vm382_vm3, %v884_v63 }
 0x907   :  { %v5001_v0 = vpop.eup %5000  ;;  %4525 = vmatpush3.msra.mxu1 %v963_v61  ;;  %4526 = vmatprep.mubr.msk.f32.mxu1 %vm5108_vm2, %v5107_v48 }
 0x908   :  { %v885_v2 = vmul.f32 %v5001_v0, %v4997_v50  ;;  %4529 = vmatprep.subr.mxu1 %v5107_v48 }
 0x90a   :  { %4527 = vmatmul.mubr.msk.f32.vlgmr.msra.gmra.mrb[14].mxu1 %vm382_vm3, %v885_v2 }
 0x90b   :  { %4531 = vmatprep.mubr.msk.f32.mxu1 %vm5108_vm2, %v5107_v48 }
 0x90e   :  { %4530 = vmatpush3.xpose.msk.msra.mxu1 %vm382_vm3, %v1041_v1 }
 0x90f   :  { %4534 = vmatprep.subr.mxu1 %v5107_v48 }
 0x911   :  { %4532 = vmatmul.mubr.msk.f32.vlgmr.msra.gmra.mrb[16].mxu1 %vm382_vm3, %v1039_v4 }
 0x912   :  { %4535 = vmatpush3.xpose.msk.msra.mxu1 %vm382_vm3, %v1119_v5  ;;  %4536 = vmatprep.mubr.msk.f32.mxu1 %vm5108_vm2, %v5107_v48 }
 0x913   :  { %4539 = vmatprep.subr.mxu1 %v5107_v48 }
 0x915   :  { %4537 = vmatmul.mubr.msk.f32.vlgmr.msra.gmra.mrb[18].mxu1 %vm382_vm3, %v1117_v6 }
 0x916   :  { %4541 = vmatprep.mubr.msk.f32.mxu1 %vm5108_vm2, %v5107_v48 }
 0x9d9   :  { %v5508_v7 = vpop.f32.mrb[12].mxu1 }
 0x9da   :  { %v4523_v8 = vpop.f32.mrb[13].mxu1 }
 0x9dd   :  { %v5510_v9 = vpop.f32.mrb[14].mxu1 }
 0x9de   :  { %v4528_v11 = vpop.f32.mrb[15].mxu1 }
 0x9e4   :  { %v1112_v12 = vpop.f32.mrb[16].mxu1 }
 0x9e5   :  { %v1113_v13 = vadd.f32 %v1112_v12, %v5430_v59  ;;  %v4533_v15 = vpop.f32.mrb[17].mxu1 }
 0x9e7   :  { %v1194_v16 = vsel %vm382_vm3, %v1113_v13, -inf }
 0x9e8   :  { %1195 = vmax.xlane.f32.xlu0 %v1194_v16  ;;  %v1190_v17 = vpop.f32.mrb[18].mxu1 }
 0x9e9   :  { %v1191_v18 = vadd.f32 %v1190_v17, %v5430_v59  ;;  %v4538_v19 = vpop.f32.mrb[19].mxu1 }
 0x9ea   :  { %v1731_v19 = vld [vmem:[%s6075_s9 + $0x8] sm:$0xff] }
 0x9eb   :  { %v1197_v20 = vsel %vm382_vm3, %v1191_v18, -inf }
 0x9ec   :  { %1198 = vmax.xlane.f32.xlu1 %v1197_v20 }
 0x9fd   :  { %1292 = vrot.lane.b32.xlu1 %v5405_v51, %s6104_s25 }
 0x9fe   :  { %1216 = vrot.lane.b32.xlu0 %v5407_v53, %s6104_s25  ;;  %s6118_s25 = smov 24  }
 0xa01   :  { %1370 = vrot.lane.b32.xlu1 %v5407_v53, %s6100_s8 }
 0xa05   :  { %1448 = vrot.lane.b32.xlu1 %v5405_v51, %s6100_s8  ;;  %s6108_s8 = smov 16  }
 0xa09   :  { %1446 = vrot.lane.b32.xlu1 %v5405_v51, %s6098_s1 }
 0xa75   :  { %v1196_v21 = vpop.xlane.xlu0 %1195 }
 0xa76   :  { %v1200_v22 = vsub.f32 %v1113_v13, %v1196_v21  ;;  %v1732_v21 = vld [vmem:[%s6075_s9 + $0x10] sm:$0xff] }
 0xa78   :  { %v1202_v23 = vmul.f32 1.442695, %v1200_v22  ;;  %v1733_v22 = vld [vmem:[%s6075_s9 + $0x18] sm:$0xff] }
 0xa79   :  { %v1217_v24 = vpop.permute.xlu0 %1216  ;;  %v1199_v25 = vpop.xlane.xlu1 %1198 }
 0xa7a   :  { %5002 = vpow2.f32 %v1202_v23  ;;  %v1201_v26 = vsub.f32 %v1191_v18, %v1199_v25  ;;  %4540 = vmatpush3.msra.mxu1 %v1217_v24  ;;  %v4847_v23 = vpack.c.bf16 %v1733_v22, %v1732_v21  ;;  %v1974_v22 = vld [vmem:[%s6081_s15] sm:$0xff] }
 0xa7b   :  { %4549 = vmatprep.subr.mxu1 %v5107_v48 }
 0xa7c   :  { %v1204_v27 = vmul.f32 1.442695, %v1201_v26 }
 0xa7d   :  { %v1293_v28 = vpop.permute.xlu1 %1292 }
 0xa7e   :  { %5004 = vpow2.f32 %v1204_v27  ;;  %4545 = vmatpush3.msra.mxu0 %v1293_v28 }
 0xa7f   :  { %4554 = vmatprep.subr.mxu0 %v5107_v48 }
 0xa81   :  { %v1371_v37 = vpop.permute.xlu1 %1370 }
 0xa84   :  { %v5003_v30 = vpop.eup %5002 }
 0xa85   :  { %v1206_v32 = vsel %vm382_vm3, %v5003_v30, 0.0  ;;  %v1449_v41 = vpop.permute.xlu1 %1448 }
 0xa86   :  { %1207 = vadd.xlane.f32.xlu0 %v1206_v32 }
 0xa88   :  { %v5005_v33 = vpop.eup %5004 }
 0xa89   :  { %v1209_v34 = vsel %vm382_vm3, %v5005_v33, 0.0  ;;  %v1447_v44 = vpop.permute.xlu1 %1446 }
 0xa8a   :  { %1210 = vadd.xlane.f32.xlu0 %v1209_v34 }
 0xaa0   :  { %1368 = vrot.lane.b32.xlu0 %v5407_v53, %s6098_s1  ;;  %s6102_s1 = smov 8  }
 0xb13   :  { %v1208_v35 = vpop.xlane.xlu0 %1207 }
 0xb14   :  { %5006 = vrcp.f32 %v1208_v35 }
 0xb17   :  { %v1211_v36 = vpop.xlane.xlu0 %1210 }
 0xb18   :  { %5008 = vrcp.f32 %v1211_v36 }
 0xb1b   :  { %v1369_v43 = vpop.permute.xlu0 %1368 }
 0xb1e   :  { %v5007_v38 = vpop.eup %5006 }
 0xb1f   :  { %v1214_v39 = vmul.f32 %v5007_v38, %v5003_v30 }
 0xb21   :  { %4542 = vmatmul.mubr.msk.f32.vlgmr.msra.gmra.mrb[20].mxu1 %vm382_vm3, %v1214_v39 }
 0xb22   :  { %v5009_v40 = vpop.eup %5008  ;;  %4550 = vmatpush3.xpose.msk.msra.mxu1 %vm382_vm3, %v1371_v37  ;;  %4551 = vmatprep.mubr.msk.f32.mxu1 %vm5108_vm2, %v5107_v48 }
 0xb23   :  { %v1215_v42 = vmul.f32 %v5009_v40, %v5005_v33  ;;  %4559 = vmatprep.subr.mxu1 %v5107_v48 }
 0xb25   :  { %4547 = vmatmul.mubr.msk.f32.vlgmr.msra.gmra.mrb[6].mxu0 %vm382_vm3, %v1215_v42  ;;  %4552 = vmatmul.mubr.msk.f32.vlgmr.msra.gmra.mrb[22].mxu1 %vm382_vm3, %v1369_v43 }
 0xb26   :  { %4555 = vmatpush3.xpose.msk.msra.mxu0 %vm382_vm3, %v1449_v41  ;;  %4556 = vmatprep.mubr.msk.f32.mxu0 %vm5108_vm2, %v5107_v48 }
 0xb27   :  { %4564 = vmatprep.subr.mxu0 %v5107_v48  ;;  %4561 = vmatprep.mubr.msk.f32.mxu1 %vm5108_vm2, %v5107_v48 }
 0xb29   :  { %4557 = vmatmul.mubr.msk.f32.vlgmr.msra.gmra.mrb[8].mxu0 %vm382_vm3, %v1447_v44 }
 0xb2a   :  { %4566 = vmatprep.mubr.msk.f32.mxu0 %vm5108_vm2, %v5107_v48 }
 0xbf4   :  { %v1288_v45 = vpop.f32.mrb[20].mxu1 }
 0xbf5   :  { %v4543_v46 = vpop.f32.mrb[21].mxu1 }
 0xbf8   :  { %v1364_v47 = vpop.f32.mrb[6].mxu0  ;;  %v1442_v49 = vpop.f32.mrb[22].mxu1 }
 0xbf9   :  { %v1443_v50 = vadd.f32 %v1442_v49, %v5430_v59  ;;  %v4548_v52 = vpop.f32.mrb[7].mxu0  ;;  %v4553_v54 = vpop.f32.mrb[23].mxu1 }
 0xbfb   :  { %v1524_v55 = vsel %vm382_vm3, %v1443_v50, -inf }
 0xbfc   :  { %v1520_v60 = vpop.f32.mrb[8].mxu0  ;;  %1525 = vmax.xlane.f32.xlu0 %v1524_v55 }
 0xbfd   :  { %v1521_v61 = vadd.f32 %v1520_v60, %v5430_v59  ;;  %v4558_v62 = vpop.f32.mrb[9].mxu0 }
 0xbff   :  { %v1527_v63 = vsel %vm382_vm3, %v1521_v61, -inf }
 0xc00   :  { %1528 = vmax.xlane.f32.xlu1 %v1527_v63 }
 0xc11   :  { %1622 = vrot.lane.b32.xlu1 %v5405_v51, %s6106_s5 }
 0xc15   :  { %1700 = vrot.lane.b32.xlu1 %v5508_v7, %s6102_s1 }
 0xc19   :  { %1702 = vrot.lane.b32.xlu1 %v5510_v9, %s6102_s1  ;;  %s6147_s1 = smov 16  }
 0xc1d   :  { %1710 = vrot.lane.b32.xlu1 %v1364_v47, %s6108_s8 }
 0xc89   :  { %v1526_v0 = vpop.xlane.xlu0 %1525 }
 0xc8a   :  { %v1530_v59 = vsub.f32 %v1443_v50, %v1526_v0  ;;  %v1868_v0 = vld [vmem:[%s6079_s13] sm:$0xff] }
 0xc8c   :  { %v1532_v1 = vmul.f32 1.442695, %v1530_v59  ;;  %v1869_v59 = vld [vmem:[%s6079_s13 + $0x8] sm:$0xff] }
 0xc8d   :  { %v1529_v2 = vpop.xlane.xlu1 %1528 }
 0xc8e   :  { %5010 = vpow2.f32 %v1532_v1  ;;  %v1531_v4 = vsub.f32 %v1521_v61, %v1529_v2  ;;  %v4851_v1 = vpack.c.bf16 %v1869_v59, %v1868_v0  ;;  %v1870_v2 = vld [vmem:[%s6079_s13 + $0x10] sm:$0xff] }
 0xc90   :  { %v1534_v5 = vmul.f32 1.442695, %v1531_v4  ;;  %v1871_v4 = vld [vmem:[%s6079_s13 + $0x18] sm:$0xff] }
 0xc91   :  { %v1623_v6 = vpop.permute.xlu1 %1622 }
 0xc92   :  { %5012 = vpow2.f32 %v1534_v5  ;;  %4565 = vmatpush3.msra.mxu0 %v1623_v6  ;;  %v4855_v5 = vpack.c.bf16 %v1871_v4, %v1870_v2 }
 0xc93   :  { %4852 = vmatprep.subr.bf16.mxu0 %v4851_v1 }
 0xc95   :  { %v1701_v28 = vpop.permute.xlu1 %1700 }
 0xc96   :  { %v1722_v33 = vsel %vm382_vm3, %v5468_v29, %v1701_v28  ;;  %v4242_v29 = vld [vmem:[%s6076_s10] ss:$0 sm:$0xff] }
 0xc97   :  { %v1978_v28 = vld [vmem:[%s6081_s15 + $0x20] sm:$0xff] }
 0xc98   :  { %v5011_v51 = vpop.eup %5010 }
 0xc99   :  { %v1536_v8 = vsel %vm382_vm3, %v5011_v51, 0.0  ;;  %v1703_v30 = vpop.permute.xlu1 %1702 }
 0xc9a   :  { %1537 = vadd.xlane.f32.xlu0 %v1536_v8  ;;  %v1723_v38 = vsel %vm382_vm3, %v5470_v31, %v1703_v30  ;;  %v1979_v30 = vld [vmem:[%s6081_s15 + $0x28] sm:$0xff] }
 0xc9c   :  { %v5013_v7 = vpop.eup %5012 }
 0xc9d   :  { %v1539_v9 = vsel %vm382_vm3, %v5013_v7, 0.0  ;;  %v1711_v34 = vpop.permute.xlu1 %1710 }
 0xc9e   :  { %1540 = vadd.xlane.f32.xlu0 %v1539_v9  ;;  %v1726_v39 = vsel %vm1724_vm6, %v1723_v38, %v1711_v34  ;;  %v1981_v34 = vld [vmem:[%s6081_s15 + $0x38] sm:$0xff] }
 0xcb4   :  { %1546 = vrot.lane.b32.xlu0 %v5407_v53, %s6106_s5  ;;  %v1730_v53 = vld [vmem:[%s6075_s9] sm:$0xff] }
 0xcb5   :  { %v4843_v20 = vpack.c.bf16 %v1731_v19, %v1730_v53 }
 0xcb8   :  { %1708 = vrot.lane.b32.xlu0 %v1288_v45, %s6108_s8  ;;  %s6145_s8 = smov 40  }
 0xd27   :  { %v1538_v11 = vpop.xlane.xlu0 %1537 }
 0xd28   :  { %5014 = vrcp.f32 %v1538_v11 }
 0xd2b   :  { %v1541_v12 = vpop.xlane.xlu0 %1540 }
 0xd2c   :  { %5016 = vrcp.f32 %v1541_v12 }
 0xd2f   :  { %v1547_v13 = vpop.permute.xlu0 %1546 }
 0xd30   :  { %4560 = vmatpush3.msra.mxu1 %v1547_v13  ;;  %v4245_v13 = vld [vmem:[%s6077_s11] ss:$0 sm:$0xff] }
 0xd31   :  { %4844 = vmatprep.subr.bf16.mxu1 %v4843_v20 }
 0xd32   :  { %v5015_v15 = vpop.eup %5014 }
 0xd33   :  { %v1544_v16 = vmul.f32 %v5015_v15, %v5011_v51  ;;  %v1709_v32 = vpop.permute.xlu0 %1708 }
 0xd34   :  { %v1725_v35 = vsel %vm1724_vm6, %v1722_v33, %v1709_v32  ;;  %v4867_v32 = vpack.c.bf16 %v1979_v30, %v1978_v28  ;;  %v1980_v33 = vld [vmem:[%s6081_s15 + $0x30] sm:$0xff] }
 0xd35   :  { %4562 = vmatmul.mubr.msk.f32.vlgmr.msra.gmra.mrb[24].mxu1 %vm382_vm3, %v1544_v16  ;;  %v4246_v16 = vld [vmem:[%s6078_s12] ss:$0 sm:$0xff] }
 0xd36   :  { %v5017_v17 = vpop.eup %5016  ;;  %4846 = vmatpush3.bf16.msra.mxu1 %v4843_v20 }
 0xd37   :  { %v1545_v18 = vmul.f32 %v5017_v17, %v5013_v7  ;;  %4848 = vmatprep.subr.bf16.mxu1 %v4847_v23 }
 0xd39   :  { %4567 = vmatmul.mubr.msk.f32.vlgmr.msra.gmra.mrb[10].mxu0 %vm382_vm3, %v1545_v18 }
 0xd3a   :  { %4850 = vmatpush3.bf16.msra.mxu1 %v4847_v23  ;;  %4854 = vmatpush3.bf16.msra.mxu0 %v4851_v1  ;;  %v1975_v23 = vld [vmem:[%s6081_s15 + $0x8] sm:$0xff] }
 0xd3b   :  { %4856 = vmatprep.subr.bf16.mxu0 %v4855_v5 }
 0xd3e   :  { %4858 = vmatpush3.bf16.msra.mxu0 %v4855_v5 }
 0xe08   :  { %v1618_v24 = vpop.f32.mrb[24].mxu1 }
 0xe09   :  { %1716 = vrot.lane.b32.xlu0 %v1618_v24, %s6118_s25  ;;  %v4563_v25 = vpop.f32.mrb[25].mxu1  ;;  %v4859_v24 = vpack.c.bf16 %v1975_v23, %v1974_v22 }
 0xe0a   :  { %v1976_v25 = vld [vmem:[%s6081_s15 + $0x10] sm:$0xff] }
 0xe0b   :  { %4860 = vmatprep.subr.bf16.mxu1 %v4859_v24 }
 0xe0c   :  { %v1694_v26 = vpop.f32.mrb[10].mxu0 }
 0xe0d   :  { %1718 = vrot.lane.b32.xlu1 %v1694_v26, %s6118_s25  ;;  %v4568_v27 = vpop.f32.mrb[11].mxu0  ;;  %v1977_v26 = vld [vmem:[%s6081_s15 + $0x18] sm:$0xff]  ;;  %s6146_s25 = smov 8  }
 0xe0e   :  { %v4863_v27 = vpack.c.bf16 %v1977_v26, %v1976_v25 }
 0xe7b   :  { %v1717_v36 = vpop.permute.xlu0 %1716 }
 0xe7c   :  { %v1728_v37 = vsel %vm1727_vm5, %v1725_v35, %v1717_v36  ;;  %v4871_v35 = vpack.c.bf16 %v1981_v34, %v1980_v33  ;;  %v1982_v36 = vld [vmem:[%s6081_s15 + $0x40] sm:$0xff]  ;;  %v4256_v34 = vld [vmem:[%s6134_s26 + $0x28] sm:$0xff] }
 0xe7d   :  { %4577 = vmatprep.mubr.msk.f32.mxu1 %vm193_vm1, %v1728_v37  ;;  %v1983_v37 = vld [vmem:[%s6081_s15 + $0x48] sm:$0xff]  ;;  %v4255_v33 = vld [vmem:[%s6134_s26 + $0x20] sm:$0xff] }
 0xe7e   :  { %v4875_v38 = vpack.c.bf16 %v1983_v37, %v1982_v36  ;;  %v4257_v36 = vld [vmem:[%s6134_s26 + $0x30] sm:$0xff]  ;;  %v4258_v37 = vld [vmem:[%s6134_s26 + $0x38] sm:$0xff] }
 0xe7f   :  { %v1719_v40 = vpop.permute.xlu1 %1718 }
 0xe80   :  { %v1729_v41 = vsel %vm1727_vm5, %v1726_v39, %v1719_v40  ;;  %v1984_v39 = vld [vmem:[%s6081_s15 + $0x50] sm:$0xff]  ;;  %v1985_v40 = vld [vmem:[%s6081_s15 + $0x58] sm:$0xff] }
 0xe81   :  { %4578 = vmatmul.mubr.msk.f32.vlgmr.msra.gmra.mrb[26].mxu1 %vm193_vm1, %v1729_v41  ;;  %v4879_v41 = vpack.c.bf16 %v1985_v40, %v1984_v39 }
 0xe82   :  { %4862 = vmatpush3.bf16.msra.mxu1 %v4859_v24 }
 0xe83   :  { %4864 = vmatprep.subr.bf16.mxu1 %v4863_v27 }
 0xe86   :  { %4866 = vmatpush3.bf16.msra.mxu1 %v4863_v27 }
 0xe87   :  { %4868 = vmatprep.subr.bf16.mxu1 %v4867_v32 }
 0xe8a   :  { %4870 = vmatpush3.bf16.msra.mxu1 %v4867_v32 }
 0xe8b   :  { %4872 = vmatprep.subr.bf16.mxu1 %v4871_v35 }
 0xe8e   :  { %4874 = vmatpush3.bf16.msra.mxu1 %v4871_v35  ;;  %v4891_v35 = vpack.c.bf16 %v4256_v34, %v4255_v33 }
 0xe8f   :  { %4876 = vmatprep.subr.bf16.mxu1 %v4875_v38 }
 0xe90   :  { %4892 = vmatprep.subr.bf16.mxu0 %v4891_v35 }
 0xe92   :  { %4878 = vmatpush3.bf16.msra.mxu1 %v4875_v38  ;;  %v4895_v38 = vpack.c.bf16 %v4258_v37, %v4257_v36 }
 0xe93   :  { %4880 = vmatprep.subr.bf16.mxu1 %v4879_v41 }
 0xe96   :  { %4882 = vmatpush3.bf16.msra.mxu1 %v4879_v41 }
 0xf54   :  { %v4579_v42 = vpop.f32.mrb[26].mxu1 }
 0xf55   :  { %v1819_v43 = vadd.f32 %v4579_v42, %v4242_v29  ;;  %v1813_v44 = vpop.f32.mrb[27].mxu1  ;;  %v1987_v42 = vld [vmem:[%s6081_s15 + $0x68] sm:$0xff] }
 0xf56   :  { %v1814_v45 = vadd.f32 %v4242_v29, %v1813_v44  ;;  %v1986_v29 = vld [vmem:[%s6081_s15 + $0x60] sm:$0xff]  ;;  %v1988_v44 = vld [vmem:[%s6081_s15 + $0x70] sm:$0xff] }
 0xf57   :  { %v5594_v46 = vadd.f32 %v1819_v43, %v5368_v14  ;;  %v4883_v43 = vpack.c.bf16 %v1987_v42, %v1986_v29 }
 0xf58   :  { %v5597_v31 = vadd.f32 %v1814_v45, %v5364_v10  ;;  %v1989_v45 = vld [vmem:[%s6081_s15 + $0x78] sm:$0xff] }
 0xf59   :  { %v1829_v47 = vsel %vm193_vm1, %v5594_v46, 0.0  ;;  %4884 = vmatprep.subr.bf16.mxu1 %v4883_v43 }
 0xf5a   :  { %1830 = vadd.xlane.f32.xlu1 %v1829_v47  ;;  %v1826_v49 = vsel %vm193_vm1, %v5597_v31, 0.0  ;;  %4886 = vmatpush3.bf16.msra.mxu1 %v4883_v43  ;;  %v4887_v47 = vpack.c.bf16 %v1989_v45, %v1988_v44  ;;  %v4253_v45 = vld [vmem:[%s6135_s3 + $0x1] ss:$0 sm:$0xff] }
 0xf5b   :  { %1827 = vadd.xlane.f32.xlu0 %v1826_v49  ;;  %v4247_v49 = vld [vmem:[%s6080_s14] ss:$0 sm:$0xff] }
 0xf5c   :  { %4888 = vmatprep.subr.bf16.mxu1 %v4887_v47 }
 0xf5e   :  { %4890 = vmatpush3.bf16.msra.mxu1 %v4887_v47 }
 0xf5f   :  { %4667 = vmatprep.subr.mxu1 %v5107_v48 }
 0xfe7   :  { %v1831_v50 = vpop.xlane.xlu1 %1830 }
 0xfe8   :  { %v1833_v52 = vmul.f32 0.03125, %v1831_v50  ;;  %v1828_v54 = vpop.xlane.xlu0 %1827 }
 0xfe9   :  { %v1832_v55 = vmul.f32 0.03125, %v1828_v54 }
 0xfea   :  { %v1835_v60 = vsub.f32 %v5594_v46, %v1833_v52 }
 0xfeb   :  { %v1834_v14 = vsub.f32 %v5597_v31, %v1832_v55 }
 0xfec   :  { %v1837_v62 = vmul.f32 %v1835_v60, %v1835_v60 }
 0xfed   :  { %v1836_v61 = vmul.f32 %v1834_v14, %v1834_v14 }
 0xfee   :  { %v1841_v63 = vsel %vm193_vm1, %v1837_v62, 0.0 }
 0xfef   :  { %v1838_v10 = vsel %vm193_vm1, %v1836_v61, 0.0 }
 0xff0   :  { %1839 = vadd.xlane.f32.xlu0 %v1838_v10 }
 0xff4   :  { %1842 = vadd.xlane.f32.xlu0 %v1841_v63 }
0x107d   :  { %v1840_v6 = vpop.xlane.xlu0 %1839 }
0x107e   :  { %v1844_v51 = vmul.f32 0.03125, %v1840_v6  ;;  %v4250_v6 = vld [vmem:[%s6082_s16] ss:$0 sm:$0xff] }
0x1080   :  { %v1846_v8 = vadd.f32 1e-05, %v1844_v51 }
0x1081   :  { %v1843_v7 = vpop.xlane.xlu0 %1842 }
0x1082   :  { %5018 = vrsqrt.f32 %v1846_v8  ;;  %v1845_v9 = vmul.f32 0.03125, %v1843_v7 }
0x1084   :  { %v1847_v11 = vadd.f32 1e-05, %v1845_v9  ;;  %v2075_v9 = vld [vmem:[%s6083_s17 + $0x8] sm:$0xff] }
0x1086   :  { %5020 = vrsqrt.f32 %v1847_v11 }
0x108c   :  { %v5019_v12 = vpop.eup %5018 }
0x108d   :  { %v1850_v15 = vmul.f32 %v5019_v12, %v1834_v14 }
0x108f   :  { %v1858_v17 = vmul.f32 %v4245_v13, %v1850_v15 }
0x1090   :  { %v5021_v18 = vpop.eup %5020 }
0x1091   :  { %v1851_v53 = vmul.f32 %v5021_v18, %v1835_v60  ;;  %v1866_v19 = vadd.f32 %v4246_v16, %v1858_v17  ;;  %v2078_v18 = vld [vmem:[%s6084_s18] sm:$0xff] }
0x1093   :  { %v1859_v20 = vmul.f32 %v4245_v13, %v1851_v53  ;;  %4588 = vmatprep.mubr.msk.f32.mxu0 %vm193_vm1, %v1866_v19  ;;  %v2074_v13 = vld [vmem:[%s6083_s17] sm:$0xff] }
0x1095   :  { %v1867_v21 = vadd.f32 %v4246_v16, %v1859_v20  ;;  %v2079_v16 = vld [vmem:[%s6084_s18 + $0x8] sm:$0xff] }
0x1097   :  { %4589 = vmatmul.mubr.msk.f32.vlgmr.msra.gmra.mrb[12].mxu0 %vm193_vm1, %v1867_v21 }
0x1098   :  { %4894 = vmatpush3.bf16.msra.mxu0 %v4891_v35 }
0x1099   :  { %4896 = vmatprep.subr.bf16.mxu0 %v4895_v38 }
0x109c   :  { %4898 = vmatpush3.bf16.msra.mxu0 %v4895_v38 }
0x109d   :  { %4637 = vmatprep.subr.mxu0 %v5107_v48 }
0x116a   :  { %v4590_v50 = vpop.f32.mrb[12].mxu0 }
0x116b   :  { %v1957_v52 = vadd.f32 %v4590_v50, %v4247_v49  ;;  %v1951_v54 = vpop.f32.mrb[13].mxu0 }
0x116c   :  { %v1952_v55 = vadd.f32 %v4247_v49, %v1951_v54 }
0x116d   :  { %v1961_v60 = vmul.f32 -1.702, %v1957_v52 }
0x116e   :  { %v1960_v14 = vmul.f32 -1.702, %v1952_v55 }
0x116f   :  { %v1964_v61 = vmul.f32 1.442695, %v1961_v60 }
0x1170   :  { %v1962_v10 = vmul.f32 1.442695, %v1960_v14 }
0x1171   :  { %5022 = vpow2.f32 %v1964_v61  ;;  %v4260_v61 = vld [vmem:[%s6137_s28 + $0x1] ss:$0 sm:$0xff]  ;;  %s6139_s28 = smov 56  }
0x1172   :  { %5024 = vpow2.f32 %v1962_v10 }
0x117b   :  { %v5023_v62 = vpop.eup %5022 }
0x117c   :  { %v5025_v63 = vpop.eup %5024  ;;  %v1967_v0 = vadd.f32 1.0, %v5023_v62 }
0x117d   :  { %v1966_v59 = vadd.f32 1.0, %v5025_v63 }
0x117e   :  { %5026 = vrcp.f32 %v1967_v0 }
0x117f   :  { %5028 = vrcp.f32 %v1966_v59 }
0x1188   :  { %v5027_v1 = vpop.eup %5026 }
0x1189   :  { %v5029_v2 = vpop.eup %5028  ;;  %v1973_v5 = vmul.f32 %v5027_v1, %v1957_v52  ;;  %v4254_v52 = vld [vmem:[%s6136_s4 + $0x1] ss:$0 sm:$0xff]  ;;  %s6138_s4 = smov 120  }
0x118a   :  { %v1972_v4 = vmul.f32 %v5029_v2, %v1952_v55  ;;  %v5758_v2 = vsel %vm241_vm7, 0.0, %v5110_v58 }
0x118c   :  { %4623 = vmatprep.mubr.f32.mxu1 %v1972_v4 }
0x118d   :  { %4624 = vmatmul.mubr.f32.vlgmr.msra.gmra.mrb[28].mxu1 %v1973_v5 }
0x118e   :  { %4669 = vmatprep.mubr.msk.f32.mxu1 %vm5108_vm2, %v5107_v48 }
0x1260   :  { %v4625_v51 = vpop.f32.mrb[28].mxu1 }
0x1261   :  { %v2069_v8 = vadd.f32 %v4625_v51, %v4250_v6  ;;  %v2063_v7 = vpop.f32.mrb[29].mxu1 }
0x1262   :  { %v2064_v11 = vadd.f32 %v4250_v6, %v2063_v7 }
0x1263   :  { %v2073_v12 = vadd.f32 %v2069_v8, %v5594_v46 }
0x1264   :  { %v2072_v15 = vadd.f32 %v2064_v11, %v5597_v31 }
0x1265   :  { %v2077_v17 = vmul.f32 %v2075_v9, %v2073_v12 }
0x1266   :  { %v2076_v53 = vmul.f32 %v2074_v13, %v2072_v15 }
0x1267   :  { %v5698_v19 = vadd.f32 %v2079_v16, %v2077_v17 }
0x1268   :  { %v5700_v20 = vadd.f32 %v2078_v18, %v2076_v53 }
0x1269   :  { %v2089_v46 = vsel %vm193_vm1, %v5698_v19, 0.0 }
0x126a   :  { %2090 = vadd.xlane.f32.xlu1 %v2089_v46  ;;  %v2086_v31 = vsel %vm193_vm1, %v5700_v20, 0.0 }
0x126b   :  { %2087 = vadd.xlane.f32.xlu0 %v2086_v31 }
0x12f7   :  { %v2091_v21 = vpop.xlane.xlu1 %2090 }
0x12f8   :  { %v2093_v22 = vmul.f32 0.03125, %v2091_v21  ;;  %v2088_v23 = vpop.xlane.xlu0 %2087 }
0x12f9   :  { %v2092_v24 = vmul.f32 0.03125, %v2088_v23 }
0x12fa   :  { %v2095_v25 = vsub.f32 %v5698_v19, %v2093_v22 }
0x12fb   :  { %v2094_v26 = vsub.f32 %v5700_v20, %v2092_v24 }
0x12fc   :  { %v2097_v27 = vmul.f32 %v2095_v25, %v2095_v25 }
0x12fd   :  { %v2096_v28 = vmul.f32 %v2094_v26, %v2094_v26 }
0x12fe   :  { %v2101_v30 = vsel %vm193_vm1, %v2097_v27, 0.0 }
0x12ff   :  { %2102 = vadd.xlane.f32.xlu1 %v2101_v30  ;;  %v2098_v32 = vsel %vm193_vm1, %v2096_v28, 0.0 }
0x1300   :  { %2099 = vadd.xlane.f32.xlu0 %v2098_v32 }
0x138c   :  { %v2103_v39 = vpop.xlane.xlu1 %2102 }
0x138d   :  { %v2105_v40 = vmul.f32 0.03125, %v2103_v39  ;;  %v2100_v41 = vpop.xlane.xlu0 %2099 }
0x138e   :  { %v2104_v29 = vmul.f32 0.03125, %v2100_v41 }
0x138f   :  { %v2107_v42 = vadd.f32 1e-05, %v2105_v40 }
0x1390   :  { %v2106_v43 = vadd.f32 1e-05, %v2104_v29 }
0x1391   :  { %5030 = vrsqrt.f32 %v2107_v42 }
0x1392   :  { %5032 = vrsqrt.f32 %v2106_v43 }
0x139b   :  { %v5031_v44 = vpop.eup %5030 }
0x139c   :  { %v5033_v47 = vpop.eup %5032  ;;  %v2111_v49 = vmul.f32 %v5031_v44, %v2095_v25 }
0x139d   :  { %v2110_v50 = vmul.f32 %v5033_v47, %v2094_v26 }
0x139e   :  { %v2119_v54 = vmul.f32 %v4253_v45, %v2111_v49 }
0x139f   :  { %v2118_v55 = vmul.f32 %v4253_v45, %v2110_v50 }
0x13a0   :  { %v2127_v14 = vadd.f32 %v4254_v52, %v2119_v54 }
0x13a1   :  { %v2126_v60 = vadd.f32 %v4254_v52, %v2118_v55 }
0x13a3   :  { %4634 = vmatprep.mubr.msk.f32.mxu0 %vm193_vm1, %v2126_v60 }
0x13a4   :  { %4635 = vmatmul.mubr.msk.f32.vlgmr.msra.gmra.mrb[14].mxu0 %vm193_vm1, %v2127_v14 }
0x13a5   :  { %4639 = vmatprep.mubr.msk.f32.mxu0 %vm5108_vm2, %v5107_v48 }
0x1477   :  { %v4636_v10 = vpop.f32.mrb[14].mxu0 }
0x1478   :  { %v5736_v62 = vadd.f32 %v4636_v10, %v4260_v61  ;;  %v2213_v63 = vpop.f32.mrb[15].mxu0 }
0x1479   :  { %v5738_v0 = vadd.f32 %v4260_v61, %v2213_v63 }
0x147a   :  { %2300 = vrot.lane.b32.xlu1 %v5736_v62, %s5109_s27 }
0x147b   :  { %2223 = vrot.lane.b32.xlu0 %v5738_v0, %s5109_s27  ;;  %s6140_s27 = smov 80  }
0x14ec   :  { %v2301_v1 = vpop.permute.xlu1 %2300 }
0x14ed   :  { %v2224_v59 = vpop.permute.xlu0 %2223 }
0x14ee   :  { %4638 = vmatpush3.xpose.msk.msra.mxu0 %vm382_vm3, %v2224_v59 }
0x14ef   :  { %4642 = vmatprep.subr.mxu0 %v5107_v48 }
0x14f1   :  { %4640 = vmatmul.mubr.msk.f32.vlgmr.msra.gmra.mrb[16].mxu0 %vm382_vm3, %v5738_v0 }
0x14f2   :  { %4643 = vmatpush3.xpose.msk.msra.mxu0 %vm382_vm3, %v2301_v1  ;;  %4644 = vmatprep.mubr.msk.f32.mxu0 %vm5108_vm2, %v5107_v48 }
0x14f3   :  { %4647 = vmatprep.subr.mxu0 %v5107_v48 }
0x14f5   :  { %4645 = vmatmul.mubr.msk.f32.vlgmr.msra.gmra.mrb[18].mxu0 %vm382_vm3, %v5736_v62 }
0x14f6   :  { %4649 = vmatprep.mubr.msk.f32.mxu0 %vm5108_vm2, %v5107_v48 }
0x15c4   :  { %v2295_v4 = vpop.f32.mrb[16].mxu0 }
0x15c5   :  { %v2296_v5 = vadd.f32 %v2295_v4, %v5758_v2  ;;  %v4641_v6 = vpop.f32.mrb[17].mxu0 }
0x15c7   :  { %v2376_v51 = vsel %vm382_vm3, %v2296_v5, -inf }
0x15c8   :  { %2377 = vmax.xlane.f32.xlu1 %v2376_v51  ;;  %v2372_v8 = vpop.f32.mrb[18].mxu0 }
0x15c9   :  { %v2373_v7 = vadd.f32 %v2372_v8, %v5758_v2  ;;  %v4646_v9 = vpop.f32.mrb[19].mxu0 }
0x15cb   :  { %v2379_v11 = vsel %vm382_vm3, %v2373_v7, -inf }
0x15cc   :  { %2380 = vmax.xlane.f32.xlu0 %v2379_v11 }
0x15d9   :  { %2474 = vrot.lane.b32.xlu1 %v5736_v62, %s5111_s6 }
0x15dd   :  { %2552 = vrot.lane.b32.xlu1 %v5738_v0, %s5112_s29 }
0x15e1   :  { %2550 = vrot.lane.b32.xlu1 %v5738_v0, %s6138_s4 }
0x1655   :  { %v2378_v58 = vpop.xlane.xlu1 %2377 }
0x1656   :  { %v2382_v12 = vsub.f32 %v2296_v5, %v2378_v58 }
0x1658   :  { %v2384_v13 = vmul.f32 1.442695, %v2382_v12 }
0x1659   :  { %v2381_v15 = vpop.xlane.xlu0 %2380  ;;  %v2475_v21 = vpop.permute.xlu1 %2474 }
0x165a   :  { %5034 = vpow2.f32 %v2384_v13  ;;  %v2383_v16 = vsub.f32 %v2373_v7, %v2381_v15 }
0x165c   :  { %v2386_v17 = vmul.f32 1.442695, %v2383_v16 }
0x165d   :  { %v2553_v22 = vpop.permute.xlu1 %2552 }
0x165e   :  { %5036 = vpow2.f32 %v2386_v17 }
0x1661   :  { %v2551_v23 = vpop.permute.xlu1 %2550 }
0x1664   :  { %v5035_v18 = vpop.eup %5034 }
0x1665   :  { %v2388_v53 = vsel %vm382_vm3, %v5035_v18, 0.0 }
0x1666   :  { %2389 = vadd.xlane.f32.xlu0 %v2388_v53 }
0x1668   :  { %v5037_v46 = vpop.eup %5036 }
0x1669   :  { %v2391_v31 = vsel %vm382_vm3, %v5037_v46, 0.0 }
0x166a   :  { %2392 = vadd.xlane.f32.xlu1 %v2391_v31 }
0x167b   :  { %2628 = vrot.lane.b32.xlu1 %v5736_v62, %s6138_s4 }
0x167c   :  { %2398 = vrot.lane.b32.xlu0 %v5738_v0, %s5111_s6  ;;  %s6141_s6 = smov 112  }
0x1680   :  { %2630 = vrot.lane.b32.xlu0 %v5736_v62, %s5112_s29  ;;  %s6142_s29 = smov 48  }
0x16f3   :  { %v2390_v24 = vpop.xlane.xlu0 %2389 }
0x16f4   :  { %5038 = vrcp.f32 %v2390_v24 }
0x16f7   :  { %v2393_v25 = vpop.xlane.xlu1 %2392  ;;  %v2399_v26 = vpop.permute.xlu0 %2398 }
0x16f8   :  { %5040 = vrcp.f32 %v2393_v25  ;;  %4648 = vmatpush3.msra.mxu0 %v2399_v26 }
0x16f9   :  { %4652 = vmatprep.subr.mxu0 %v5107_v48 }
0x16fb   :  { %v2631_v33 = vpop.permute.xlu0 %2630  ;;  %v2629_v34 = vpop.permute.xlu1 %2628 }
0x16fe   :  { %v5039_v27 = vpop.eup %5038 }
0x16ff   :  { %v2396_v28 = vmul.f32 %v5039_v27, %v5035_v18 }
0x1701   :  { %4650 = vmatmul.mubr.msk.f32.vlgmr.msra.gmra.mrb[20].mxu0 %vm382_vm3, %v2396_v28 }
0x1702   :  { %v5041_v30 = vpop.eup %5040  ;;  %4653 = vmatpush3.msra.mxu0 %v2475_v21  ;;  %4654 = vmatprep.mubr.msk.f32.mxu0 %vm5108_vm2, %v5107_v48 }
0x1703   :  { %v2397_v32 = vmul.f32 %v5041_v30, %v5037_v46  ;;  %4657 = vmatprep.subr.mxu0 %v5107_v48 }
0x1705   :  { %4655 = vmatmul.mubr.msk.f32.vlgmr.msra.gmra.mrb[22].mxu0 %vm382_vm3, %v2397_v32 }
0x1706   :  { %4659 = vmatprep.mubr.msk.f32.mxu0 %vm5108_vm2, %v5107_v48 }
0x1709   :  { %4658 = vmatpush3.xpose.msk.msra.mxu0 %vm382_vm3, %v2553_v22 }
0x170a   :  { %4662 = vmatprep.subr.mxu0 %v5107_v48 }
0x170c   :  { %4660 = vmatmul.mubr.msk.f32.vlgmr.msra.gmra.mrb[24].mxu0 %vm382_vm3, %v2551_v23 }
0x170d   :  { %4663 = vmatpush3.xpose.msk.msra.mxu0 %vm382_vm3, %v2631_v33  ;;  %4664 = vmatprep.mubr.msk.f32.mxu0 %vm5108_vm2, %v5107_v48 }
0x170e   :  { %4672 = vmatprep.subr.mxu0 %v5107_v48 }
0x1710   :  { %4665 = vmatmul.mubr.msk.f32.vlgmr.msra.gmra.mrb[26].mxu0 %vm382_vm3, %v2629_v34 }
0x1711   :  { %4674 = vmatprep.mubr.msk.f32.mxu0 %vm5108_vm2, %v5107_v48 }
0x17d4   :  { %v5796_v35 = vpop.f32.mrb[20].mxu0 }
0x17d5   :  { %v4651_v36 = vpop.f32.mrb[21].mxu0 }
0x17d8   :  { %v5798_v37 = vpop.f32.mrb[22].mxu0 }
0x17d9   :  { %v4656_v38 = vpop.f32.mrb[23].mxu0 }
0x17df   :  { %v2624_v39 = vpop.f32.mrb[24].mxu0 }
0x17e0   :  { %v2625_v40 = vadd.f32 %v2624_v39, %v5758_v2  ;;  %v4661_v41 = vpop.f32.mrb[25].mxu0 }
0x17e2   :  { %v2706_v29 = vsel %vm382_vm3, %v2625_v40, -inf }
0x17e3   :  { %2707 = vmax.xlane.f32.xlu0 %v2706_v29  ;;  %v2702_v42 = vpop.f32.mrb[26].mxu0 }
0x17e4   :  { %v2703_v43 = vadd.f32 %v2702_v42, %v5758_v2  ;;  %v4666_v44 = vpop.f32.mrb[27].mxu0 }
0x17e6   :  { %v2709_v45 = vsel %vm382_vm3, %v2703_v43, -inf }
0x17e7   :  { %2710 = vmax.xlane.f32.xlu1 %v2709_v45 }
0x17f8   :  { %2804 = vrot.lane.b32.xlu1 %v5736_v62, %s6139_s28 }
0x17f9   :  { %2728 = vrot.lane.b32.xlu0 %v5738_v0, %s6139_s28  ;;  %s6148_s28 = smov 24  }
0x17fc   :  { %2882 = vrot.lane.b32.xlu1 %v5738_v0, %s6140_s27 }
0x1800   :  { %2960 = vrot.lane.b32.xlu1 %v5736_v62, %s6140_s27 }
0x1804   :  { %2958 = vrot.lane.b32.xlu1 %v5736_v62, %s6141_s6 }
0x1870   :  { %v2708_v47 = vpop.xlane.xlu0 %2707 }
0x1871   :  { %v2712_v49 = vsub.f32 %v2625_v40, %v2708_v47 }
0x1873   :  { %v2714_v50 = vmul.f32 1.442695, %v2712_v49 }
0x1874   :  { %v2729_v52 = vpop.permute.xlu0 %2728  ;;  %v2711_v54 = vpop.xlane.xlu1 %2710 }
0x1875   :  { %5042 = vpow2.f32 %v2714_v50  ;;  %v2713_v55 = vsub.f32 %v2703_v43, %v2711_v54  ;;  %4668 = vmatpush3.msra.mxu1 %v2729_v52 }
0x1876   :  { %4677 = vmatprep.subr.mxu1 %v5107_v48 }
0x1877   :  { %v2716_v60 = vmul.f32 1.442695, %v2713_v55 }
0x1878   :  { %v2805_v14 = vpop.permute.xlu1 %2804 }
0x1879   :  { %5044 = vpow2.f32 %v2716_v60  ;;  %4673 = vmatpush3.msra.mxu0 %v2805_v14 }
0x187a   :  { %4682 = vmatprep.subr.mxu0 %v5107_v48 }
0x187c   :  { %v2883_v5 = vpop.permute.xlu1 %2882 }
0x187f   :  { %v5043_v61 = vpop.eup %5042 }
0x1880   :  { %v2718_v10 = vsel %vm382_vm3, %v5043_v61, 0.0  ;;  %v2961_v7 = vpop.permute.xlu1 %2960 }
0x1881   :  { %2719 = vadd.xlane.f32.xlu0 %v2718_v10 }
0x1883   :  { %v5045_v63 = vpop.eup %5044 }
0x1884   :  { %v2721_v59 = vsel %vm382_vm3, %v5045_v63, 0.0  ;;  %v2959_v58 = vpop.permute.xlu1 %2958 }
0x1885   :  { %2722 = vadd.xlane.f32.xlu0 %v2721_v59 }
0x189b   :  { %2880 = vrot.lane.b32.xlu0 %v5738_v0, %s6141_s6 }
0x190e   :  { %v2720_v1 = vpop.xlane.xlu0 %2719 }
0x190f   :  { %5046 = vrcp.f32 %v2720_v1 }
0x1912   :  { %v2723_v4 = vpop.xlane.xlu0 %2722 }
0x1913   :  { %5048 = vrcp.f32 %v2723_v4 }
0x1916   :  { %v2881_v11 = vpop.permute.xlu0 %2880 }
0x1919   :  { %v5047_v6 = vpop.eup %5046 }
0x191a   :  { %v2726_v51 = vmul.f32 %v5047_v6, %v5043_v61 }
0x191c   :  { %4670 = vmatmul.mubr.msk.f32.vlgmr.msra.gmra.mrb[30].mxu1 %vm382_vm3, %v2726_v51 }
0x191d   :  { %v5049_v8 = vpop.eup %5048  ;;  %4678 = vmatpush3.xpose.msk.msra.mxu1 %vm382_vm3, %v2883_v5  ;;  %4679 = vmatprep.mubr.msk.f32.mxu1 %vm5108_vm2, %v5107_v48 }
0x191e   :  { %v2727_v9 = vmul.f32 %v5049_v8, %v5045_v63  ;;  %4687 = vmatprep.subr.mxu1 %v5107_v48 }
0x1920   :  { %4675 = vmatmul.mubr.msk.f32.vlgmr.msra.gmra.mrb[28].mxu0 %vm382_vm3, %v2727_v9  ;;  %4680 = vmatmul.mubr.msk.f32.vlgmr.msra.gmra.mrb[32].mxu1 %vm382_vm3, %v2881_v11 }
0x1921   :  { %4683 = vmatpush3.xpose.msk.msra.mxu0 %vm382_vm3, %v2961_v7  ;;  %4684 = vmatprep.mubr.msk.f32.mxu0 %vm5108_vm2, %v5107_v48 }
0x1922   :  { %4692 = vmatprep.subr.mxu0 %v5107_v48  ;;  %4689 = vmatprep.mubr.msk.f32.mxu1 %vm5108_vm2, %v5107_v48 }
0x1924   :  { %4685 = vmatmul.mubr.msk.f32.vlgmr.msra.gmra.mrb[30].mxu0 %vm382_vm3, %v2959_v58 }
0x1925   :  { %4694 = vmatprep.mubr.msk.f32.mxu0 %vm5108_vm2, %v5107_v48 }
0x19ef   :  { %v5836_v12 = vpop.f32.mrb[30].mxu1 }
0x19f0   :  { %v4671_v13 = vpop.f32.mrb[31].mxu1 }
0x19f3   :  { %v5838_v15 = vpop.f32.mrb[28].mxu0  ;;  %v2954_v16 = vpop.f32.mrb[32].mxu1 }
0x19f4   :  { %v2955_v17 = vadd.f32 %v2954_v16, %v5758_v2  ;;  %v4676_v18 = vpop.f32.mrb[29].mxu0  ;;  %v4681_v53 = vpop.f32.mrb[33].mxu1 }
0x19f6   :  { %v3036_v46 = vsel %vm382_vm3, %v2955_v17, -inf }
0x19f7   :  { %3037 = vmax.xlane.f32.xlu0 %v3036_v46  ;;  %v3032_v31 = vpop.f32.mrb[30].mxu0 }
0x19f8   :  { %v3033_v21 = vadd.f32 %v3032_v31, %v5758_v2  ;;  %v4686_v22 = vpop.f32.mrb[31].mxu0 }
0x19fa   :  { %v3039_v23 = vsel %vm382_vm3, %v3033_v21, -inf }
0x19fb   :  { %3040 = vmax.xlane.f32.xlu1 %v3039_v23  ;;  %v4289_v23 = vld [vmem:[%s6075_s9 + $0x30] sm:$0xff] }
0x1a0c   :  { %3134 = vrot.lane.b32.xlu1 %v5736_v62, %s6142_s29 }
0x1a0d   :  { %3058 = vrot.lane.b32.xlu0 %v5738_v0, %s6142_s29 }
0x1a10   :  { %3212 = vrot.lane.b32.xlu1 %v5738_v0, %s6143_s2 }
0x1a14   :  { %3290 = vrot.lane.b32.xlu1 %v5736_v62, %s6143_s2 }
0x1a18   :  { %3288 = vrot.lane.b32.xlu1 %v5736_v62, %s6144_s30 }
0x1a84   :  { %v3038_v24 = vpop.xlane.xlu0 %3037 }
0x1a85   :  { %v3042_v25 = vsub.f32 %v2955_v17, %v3038_v24  ;;  %v4290_v24 = vld [vmem:[%s6075_s9 + $0x38] sm:$0xff] }
0x1a87   :  { %v3044_v26 = vmul.f32 1.442695, %v3042_v25  ;;  %v4903_v25 = vpack.c.bf16 %v4290_v24, %v4289_v23  ;;  %v4307_v23 = vld [vmem:[%s6081_s15 + $0x80] sm:$0xff]  ;;  %v4308_v24 = vld [vmem:[%s6081_s15 + $0x88] sm:$0xff] }
0x1a88   :  { %v3059_v27 = vpop.permute.xlu0 %3058  ;;  %v3041_v28 = vpop.xlane.xlu1 %3040 }
0x1a89   :  { %5050 = vpow2.f32 %v3044_v26  ;;  %v3043_v30 = vsub.f32 %v3033_v21, %v3041_v28  ;;  %4688 = vmatpush3.msra.mxu1 %v3059_v27  ;;  %v4288_v21 = vld [vmem:[%s6075_s9 + $0x28] sm:$0xff] }
0x1a8a   :  { %4697 = vmatprep.subr.mxu1 %v5107_v48 }
0x1a8b   :  { %v3046_v32 = vmul.f32 1.442695, %v3043_v30 }
0x1a8c   :  { %v3135_v33 = vpop.permute.xlu1 %3134 }
0x1a8d   :  { %5052 = vpow2.f32 %v3046_v32  ;;  %4693 = vmatpush3.msra.mxu0 %v3135_v33 }
0x1a8e   :  { %4702 = vmatprep.subr.mxu0 %v5107_v48 }
0x1a90   :  { %v3213_v29 = vpop.permute.xlu1 %3212 }
0x1a93   :  { %v5051_v34 = vpop.eup %5050 }
0x1a94   :  { %v3048_v36 = vsel %vm382_vm3, %v5051_v34, 0.0  ;;  %v3291_v45 = vpop.permute.xlu1 %3290 }
0x1a95   :  { %3049 = vadd.xlane.f32.xlu0 %v3048_v36 }
0x1a97   :  { %v5053_v38 = vpop.eup %5052 }
0x1a98   :  { %v3051_v39 = vsel %vm382_vm3, %v5053_v38, 0.0  ;;  %v3289_v50 = vpop.permute.xlu1 %3288 }
0x1a99   :  { %3052 = vadd.xlane.f32.xlu0 %v3051_v39 }
0x1aaf   :  { %3210 = vrot.lane.b32.xlu0 %v5738_v0, %s6144_s30 }
0x1b22   :  { %v3050_v40 = vpop.xlane.xlu0 %3049 }
0x1b23   :  { %5054 = vrcp.f32 %v3050_v40 }
0x1b26   :  { %v3053_v41 = vpop.xlane.xlu0 %3052 }
0x1b27   :  { %5056 = vrcp.f32 %v3053_v41 }
0x1b2a   :  { %v3211_v49 = vpop.permute.xlu0 %3210 }
0x1b2d   :  { %v5055_v42 = vpop.eup %5054 }
0x1b2e   :  { %v3056_v43 = vmul.f32 %v5055_v42, %v5051_v34 }
0x1b30   :  { %4690 = vmatmul.mubr.msk.f32.vlgmr.msra.gmra.mrb[34].mxu1 %vm382_vm3, %v3056_v43 }
0x1b31   :  { %v5057_v44 = vpop.eup %5056  ;;  %4698 = vmatpush3.xpose.msk.msra.mxu1 %vm382_vm3, %v3213_v29  ;;  %4699 = vmatprep.mubr.msk.f32.mxu1 %vm5108_vm2, %v5107_v48 }
0x1b32   :  { %v3057_v47 = vmul.f32 %v5057_v44, %v5053_v38  ;;  %4707 = vmatprep.subr.mxu1 %v5107_v48 }
0x1b34   :  { %4695 = vmatmul.mubr.msk.f32.vlgmr.msra.gmra.mrb[32].mxu0 %vm382_vm3, %v3057_v47  ;;  %4700 = vmatmul.mubr.msk.f32.vlgmr.msra.gmra.mrb[36].mxu1 %vm382_vm3, %v3211_v49 }
0x1b35   :  { %4703 = vmatpush3.xpose.msk.msra.mxu0 %vm382_vm3, %v3291_v45  ;;  %4704 = vmatprep.mubr.msk.f32.mxu0 %vm5108_vm2, %v5107_v48 }
0x1b36   :  { %4712 = vmatprep.subr.mxu0 %v5107_v48  ;;  %4709 = vmatprep.mubr.msk.f32.mxu1 %vm5108_vm2, %v5107_v48 }
0x1b38   :  { %4705 = vmatmul.mubr.msk.f32.vlgmr.msra.gmra.mrb[34].mxu0 %vm382_vm3, %v3289_v50 }
0x1b39   :  { %4714 = vmatprep.mubr.msk.f32.mxu0 %vm5108_vm2, %v5107_v48 }
0x1c03   :  { %v3130_v52 = vpop.f32.mrb[34].mxu1 }
0x1c04   :  { %v4691_v54 = vpop.f32.mrb[35].mxu1 }
0x1c07   :  { %v3206_v55 = vpop.f32.mrb[32].mxu0  ;;  %v3284_v60 = vpop.f32.mrb[36].mxu1 }
0x1c08   :  { %v3285_v14 = vadd.f32 %v3284_v60, %v5758_v2  ;;  %v4696_v61 = vpop.f32.mrb[33].mxu0  ;;  %v4701_v10 = vpop.f32.mrb[37].mxu1 }
0x1c0a   :  { %v3366_v63 = vsel %vm382_vm3, %v3285_v14, -inf }
0x1c0b   :  { %3367 = vmax.xlane.f32.xlu0 %v3366_v63  ;;  %v3362_v59 = vpop.f32.mrb[34].mxu0 }
0x1c0c   :  { %v3363_v1 = vadd.f32 %v3362_v59, %v5758_v2  ;;  %v4706_v4 = vpop.f32.mrb[35].mxu0 }
0x1c0e   :  { %v3369_v5 = vsel %vm382_vm3, %v3363_v1, -inf }
0x1c0f   :  { %3370 = vmax.xlane.f32.xlu1 %v3369_v5  ;;  %v4299_v5 = vld [vmem:[%s6079_s13 + $0x20] sm:$0xff] }
0x1c20   :  { %3464 = vrot.lane.b32.xlu1 %v5736_v62, %s6145_s8 }
0x1c24   :  { %3542 = vrot.lane.b32.xlu1 %v5836_v12, %s6146_s25 }
0x1c28   :  { %3544 = vrot.lane.b32.xlu1 %v5838_v15, %s6146_s25 }
0x1c2c   :  { %3552 = vrot.lane.b32.xlu1 %v3206_v55, %s6147_s1 }
0x1c98   :  { %v3368_v6 = vpop.xlane.xlu0 %3367 }
0x1c99   :  { %v3372_v51 = vsub.f32 %v3285_v14, %v3368_v6  ;;  %v4300_v6 = vld [vmem:[%s6079_s13 + $0x28] sm:$0xff] }
0x1c9b   :  { %v3374_v8 = vmul.f32 1.442695, %v3372_v51  ;;  %v4907_v51 = vpack.c.bf16 %v4300_v6, %v4299_v5 }
0x1c9c   :  { %v3371_v7 = vpop.xlane.xlu1 %3370 }
0x1c9d   :  { %5058 = vpow2.f32 %v3374_v8  ;;  %v3373_v2 = vsub.f32 %v3363_v1, %v3371_v7  ;;  %v4301_v8 = vld [vmem:[%s6079_s13 + $0x30] sm:$0xff]  ;;  %v4302_v7 = vld [vmem:[%s6079_s13 + $0x38] sm:$0xff] }
0x1c9f   :  { %v3376_v9 = vmul.f32 1.442695, %v3373_v2  ;;  %v4911_v2 = vpack.c.bf16 %v4302_v7, %v4301_v8 }
0x1ca0   :  { %v3465_v11 = vpop.permute.xlu1 %3464 }
0x1ca1   :  { %5060 = vpow2.f32 %v3376_v9  ;;  %4713 = vmatpush3.msra.mxu0 %v3465_v11 }
0x1ca2   :  { %4908 = vmatprep.subr.bf16.mxu0 %v4907_v51 }
0x1ca4   :  { %v3543_v32 = vpop.permute.xlu1 %3542 }
0x1ca5   :  { %v3564_v36 = vsel %vm382_vm3, %v5796_v35, %v3543_v32  ;;  %v4292_v35 = vld [vmem:[%s6076_s10 + $0x1] ss:$0 sm:$0xff]  ;;  %v4312_v32 = vld [vmem:[%s6081_s15 + $0xa8] sm:$0xff] }
0x1ca7   :  { %v5059_v58 = vpop.eup %5058 }
0x1ca8   :  { %v3378_v62 = vsel %vm382_vm3, %v5059_v58, 0.0  ;;  %v3545_v33 = vpop.permute.xlu1 %3544 }
0x1ca9   :  { %3379 = vadd.xlane.f32.xlu0 %v3378_v62  ;;  %v3565_v29 = vsel %vm382_vm3, %v5798_v37, %v3545_v33 }
0x1cab   :  { %v5061_v12 = vpop.eup %5060 }
0x1cac   :  { %v3381_v13 = vsel %vm382_vm3, %v5061_v12, 0.0  ;;  %v3553_v38 = vpop.permute.xlu1 %3552 }
0x1cad   :  { %3382 = vadd.xlane.f32.xlu0 %v3381_v13  ;;  %v3567_v42 = vsel %vm1724_vm6, %v3565_v29, %v3553_v38  ;;  %v4317_v29 = vld [vmem:[%s6081_s15 + $0xd0] sm:$0xff] }
0x1cc3   :  { %3388 = vrot.lane.b32.xlu0 %v5738_v0, %s6145_s8  ;;  %v4287_v0 = vld [vmem:[%s6075_s9 + $0x20] sm:$0xff] }
0x1cc4   :  { %v4899_v22 = vpack.c.bf16 %v4288_v21, %v4287_v0 }
0x1cc7   :  { %3550 = vrot.lane.b32.xlu0 %v3130_v52, %s6147_s1 }
0x1d36   :  { %v3380_v15 = vpop.xlane.xlu0 %3379 }
0x1d37   :  { %5062 = vrcp.f32 %v3380_v15 }
0x1d3a   :  { %v3383_v16 = vpop.xlane.xlu0 %3382 }
0x1d3b   :  { %5064 = vrcp.f32 %v3383_v16  ;;  %v4297_v16 = vld [vmem:[%s6077_s11 + $0x1] ss:$0 sm:$0xff] }
0x1d3e   :  { %v3389_v17 = vpop.permute.xlu0 %3388 }
0x1d3f   :  { %4708 = vmatpush3.msra.mxu1 %v3389_v17 }
0x1d40   :  { %4900 = vmatprep.subr.bf16.mxu1 %v4899_v22 }
0x1d41   :  { %v5063_v18 = vpop.eup %5062 }
0x1d42   :  { %v3386_v53 = vmul.f32 %v5063_v18, %v5059_v58  ;;  %v3551_v34 = vpop.permute.xlu0 %3550  ;;  %v4298_v18 = vld [vmem:[%s6078_s12 + $0x1] ss:$0 sm:$0xff]  ;;  %s5124_s12 = smov [#allocation3]  }
0x1d43   :  { %v3566_v39 = vsel %vm1724_vm6, %v3564_v36, %v3551_v34  ;;  %v4313_v34 = vld [vmem:[%s6081_s15 + $0xb0] sm:$0xff]  ;;  %v4314_v36 = vld [vmem:[%s6081_s15 + $0xb8] sm:$0xff]  ;;  %s4201_s3 = sshll.u32 %s5124_s12, 4  ;;  %s4202_s3 = int_to_ptr.vmem [resolvable:$true] %s4201_s3 }
0x1d44   :  { %4710 = vmatmul.mubr.msk.f32.vlgmr.msra.gmra.mrb[38].mxu1 %vm382_vm3, %v3386_v53  ;;  %v4927_v38 = vpack.c.bf16 %v4314_v36, %v4313_v34  ;;  %v4328_v36 = vld [vmem:[%s6086_s20] ss:$0 sm:$0xff]  ;;  %p5087_p1 = scmp.lt.s32.totalorder %s4202_s3, %s4202_s3 }
0x1d45   :  { %v5065_v46 = vpop.eup %5064  ;;  %4902 = vmatpush3.bf16.msra.mxu1 %v4899_v22 }
0x1d46   :  { %v3387_v31 = vmul.f32 %v5065_v46, %v5061_v12  ;;  %4904 = vmatprep.subr.bf16.mxu1 %v4903_v25 }
0x1d48   :  { %4715 = vmatmul.mubr.msk.f32.vlgmr.msra.gmra.mrb[36].mxu0 %vm382_vm3, %v3387_v31 }
0x1d49   :  { %4906 = vmatpush3.bf16.msra.mxu1 %v4903_v25  ;;  %4910 = vmatpush3.bf16.msra.mxu0 %v4907_v51  ;;  %v4915_v25 = vpack.c.bf16 %v4308_v24, %v4307_v23  ;;  %v4033_v24 = vld [vmem:[%s6087_s21 + $0x10] sm:$0xff] }
0x1d4a   :  { %4912 = vmatprep.subr.bf16.mxu0 %v4911_v2 }
0x1d4b   :  { %4916 = vmatprep.subr.bf16.mxu1 %v4915_v25 }
0x1d4d   :  { %4914 = vmatpush3.bf16.msra.mxu0 %v4911_v2  ;;  %v3923_v2 = vshrl.u32 %v237_v56, 7 }
0x1d4e   :  { %4947 = vmatprep.subr.bf16.mxu0 %v5106_v3 }
0x1e17   :  { %v3460_v26 = vpop.f32.mrb[38].mxu1 }
0x1e18   :  { %3558 = vrot.lane.b32.xlu0 %v3460_v26, %s6148_s28  ;;  %v4711_v27 = vpop.f32.mrb[39].mxu1  ;;  %v4309_v26 = vld [vmem:[%s6081_s15 + $0x90] sm:$0xff] }
0x1e19   :  { %v4310_v27 = vld [vmem:[%s6081_s15 + $0x98] sm:$0xff] }
0x1e1b   :  { %v3536_v28 = vpop.f32.mrb[36].mxu0 }
0x1e1c   :  { %3560 = vrot.lane.b32.xlu1 %v3536_v28, %s6148_s28  ;;  %v4716_v30 = vpop.f32.mrb[37].mxu0  ;;  %v4919_v28 = vpack.c.bf16 %v4310_v27, %v4309_v26 }
0x1e1d   :  { %v4311_v30 = vld [vmem:[%s6081_s15 + $0xa0] sm:$0xff] }
0x1e1e   :  { %v4923_v33 = vpack.c.bf16 %v4312_v32, %v4311_v30 }
0x1e8a   :  { %v3559_v40 = vpop.permute.xlu0 %3558 }
0x1e8b   :  { %v3568_v41 = vsel %vm1727_vm5, %v3566_v39, %v3559_v40  ;;  %v4315_v39 = vld [vmem:[%s6081_s15 + $0xc0] sm:$0xff]  ;;  %v4316_v40 = vld [vmem:[%s6081_s15 + $0xc8] sm:$0xff] }
0x1e8c   :  { %4725 = vmatprep.mubr.msk.f32.mxu1 %vm193_vm1, %v3568_v41  ;;  %v4931_v41 = vpack.c.bf16 %v4316_v40, %v4315_v39 }
0x1e8e   :  { %v3561_v43 = vpop.permute.xlu1 %3560 }
0x1e8f   :  { %v3569_v44 = vsel %vm1727_vm5, %v3567_v42, %v3561_v43  ;;  %v4318_v42 = vld [vmem:[%s6081_s15 + $0xd8] sm:$0xff] }
0x1e90   :  { %4726 = vmatmul.mubr.msk.f32.vlgmr.msra.gmra.mrb[40].mxu1 %vm193_vm1, %v3569_v44  ;;  %v4935_v43 = vpack.c.bf16 %v4318_v42, %v4317_v29  ;;  %v4319_v44 = vld [vmem:[%s6081_s15 + $0xe0] sm:$0xff] }
0x1e91   :  { %4918 = vmatpush3.bf16.msra.mxu1 %v4915_v25  ;;  %v4034_v25 = vld [vmem:[%s6087_s21 + $0x18] sm:$0xff]  ;;  %v4115_v42 = vld [vmem:[%s6088_s22] sm:$0xff] }
0x1e92   :  { %4920 = vmatprep.subr.bf16.mxu1 %v4919_v28  ;;  %v4954_v26 = vpack.c.bf16 %v4034_v25, %v4033_v24 }
0x1e95   :  { %4922 = vmatpush3.bf16.msra.mxu1 %v4919_v28 }
0x1e96   :  { %4924 = vmatprep.subr.bf16.mxu1 %v4923_v33 }
0x1e99   :  { %4926 = vmatpush3.bf16.msra.mxu1 %v4923_v33  ;;  %v4327_v33 = vld [vmem:[%s6085_s19] ss:$0 sm:$0xff] }
0x1e9a   :  { %4928 = vmatprep.subr.bf16.mxu1 %v4927_v38 }
0x1e9d   :  { %4930 = vmatpush3.bf16.msra.mxu1 %v4927_v38 }
0x1e9e   :  { %4932 = vmatprep.subr.bf16.mxu1 %v4931_v41 }
0x1ea1   :  { %4934 = vmatpush3.bf16.msra.mxu1 %v4931_v41 }
0x1ea2   :  { %4936 = vmatprep.subr.bf16.mxu1 %v4935_v43 }
0x1ea5   :  { %4938 = vmatpush3.bf16.msra.mxu1 %v4935_v43  ;;  %v4116_v43 = vld [vmem:[%s6088_s22 + $0x8] sm:$0xff]  ;;  %s5082_s22 = scalar_lea.vmem %s4202_s3, 32 }
0x1ea6   :  { %p5083_p0 = scmp.ne.s32.totalorder %s4202_s3, %s5082_s22  ;;  %p5088_p2 = scmp.lt.s32.totalorder %s5082_s22, %s5082_s22 }
0x1ea8   :  { %p5089_p3 = por %p5088_p2, %p5087_p1 }
0x1eaa   :  { %p5090_p4 = pnand %p5089_p3, %p5083_p0 }
0x1f63   :  { %v4727_v45 = vpop.f32.mrb[40].mxu1 }
0x1f64   :  { %v3661_v47 = vadd.f32 %v4727_v45, %v4292_v35  ;;  %v3655_v49 = vpop.f32.mrb[41].mxu1 }
0x1f65   :  { %v3656_v50 = vadd.f32 %v4292_v35, %v3655_v49  ;;  %v4320_v35 = vld [vmem:[%s6081_s15 + $0xe8] sm:$0xff]  ;;  %v4322_v49 = vld [vmem:[%s6081_s15 + $0xf8] sm:$0xff] }
0x1f66   :  { %v5922_v52 = vadd.f32 %v3661_v47, %v5698_v19  ;;  %v4939_v45 = vpack.c.bf16 %v4320_v35, %v4319_v44  ;;  %v4321_v47 = vld [vmem:[%s6081_s15 + $0xf0] sm:$0xff]  ;;  %v4957_v44 = vpack.c.bf16 %v4116_v43, %v4115_v42 }
0x1f67   :  { %v5925_v37 = vadd.f32 %v3656_v50, %v5700_v20  ;;  %v4943_v50 = vpack.c.bf16 %v4322_v49, %v4321_v47  ;;  %v4191_v47 = vstv %s6089_s23 }
0x1f68   :  { %v3673_v54 = vsel %vm193_vm1, %v5922_v52, 0.0  ;;  %4940 = vmatprep.subr.bf16.mxu1 %v4939_v45 }
0x1f69   :  { %3674 = vadd.xlane.f32.xlu1 %v3673_v54  ;;  %v3670_v55 = vsel %vm193_vm1, %v5925_v37, 0.0  ;;  %4942 = vmatpush3.bf16.msra.mxu1 %v4939_v45  ;;  %v4304_v54 = vld [vmem:[%s6080_s14 + $0x1] ss:$0 sm:$0xff] }
0x1f6a   :  { %3671 = vadd.xlane.f32.xlu0 %v3670_v55  ;;  %4944 = vmatprep.subr.bf16.mxu1 %v4943_v50 }
0x1f6d   :  { %4946 = vmatpush3.bf16.msra.mxu1 %v4943_v50 }
0x1ff6   :  { %v3675_v60 = vpop.xlane.xlu1 %3674 }
0x1ff7   :  { %v3677_v14 = vmul.f32 0.03125, %v3675_v60  ;;  %v3672_v61 = vpop.xlane.xlu0 %3671 }
0x1ff8   :  { %v3676_v10 = vmul.f32 0.03125, %v3672_v61 }
0x1ff9   :  { %v3679_v63 = vsub.f32 %v5922_v52, %v3677_v14 }
0x1ffa   :  { %v3678_v19 = vsub.f32 %v5925_v37, %v3676_v10 }
0x1ffb   :  { %v3681_v1 = vmul.f32 %v3679_v63, %v3679_v63 }
0x1ffc   :  { %v3680_v59 = vmul.f32 %v3678_v19, %v3678_v19 }
0x1ffd   :  { %v3685_v4 = vsel %vm193_vm1, %v3681_v1, 0.0 }
0x1ffe   :  { %v3682_v20 = vsel %vm193_vm1, %v3680_v59, 0.0 }
0x1fff   :  { %3683 = vadd.xlane.f32.xlu0 %v3682_v20 }
0x2003   :  { %3686 = vadd.xlane.f32.xlu0 %v3685_v4 }
0x208c   :  { %v3684_v9 = vpop.xlane.xlu0 %3683 }
0x208d   :  { %v3688_v11 = vmul.f32 0.03125, %v3684_v9  ;;  %v4324_v9 = vld [vmem:[%s6082_s16 + $0x1] ss:$0 sm:$0xff] }
0x208f   :  { %v3690_v58 = vadd.f32 1e-05, %v3688_v11 }
0x2090   :  { %v3687_v62 = vpop.xlane.xlu0 %3686 }
0x2091   :  { %5066 = vrsqrt.f32 %v3690_v58  ;;  %v3689_v12 = vmul.f32 0.03125, %v3687_v62 }
0x2093   :  { %v3691_v13 = vadd.f32 1e-05, %v3689_v12  ;;  %v3924_v12 = vmul.u32 8, %v3923_v2 }
0x2095   :  { %5068 = vrsqrt.f32 %v3691_v13  ;;  %vm3925_vm8 = vcmp.eq.s32.totalorder %v5426_v57, %v3924_v12 }
0x209b   :  { %v5067_v15 = vpop.eup %5066 }
0x209c   :  { %v3694_v17 = vmul.f32 %v5067_v15, %v3678_v19 }
0x209e   :  { %v3702_v53 = vmul.f32 %v4297_v16, %v3694_v17 }
0x209f   :  { %v5069_v46 = vpop.eup %5068 }
0x20a0   :  { %v3695_v31 = vmul.f32 %v5069_v46, %v3679_v63  ;;  %v3710_v0 = vadd.f32 %v4298_v18, %v3702_v53 }
0x20a2   :  { %v3703_v21 = vmul.f32 %v4297_v16, %v3695_v31  ;;  %4736 = vmatprep.mubr.msk.f32.mxu0 %vm193_vm1, %v3710_v0 }
0x20a4   :  { %v3711_v22 = vadd.f32 %v4298_v18, %v3703_v21  ;;  %v4325_v18 = vsel %vm3925_vm8, 1.0, %v5107_v48  ;;  %v4031_v21 = vld [vmem:[%s6087_s21] sm:$0xff] }
0x20a6   :  { %4737 = vmatmul.mubr.msk.f32.vlgmr.msra.gmra.mrb[38].mxu0 %vm193_vm1, %v3711_v22  ;;  %v4032_v22 = vld [vmem:[%s6087_s21 + $0x8] sm:$0xff] }
0x20a7   :  { %4778 = vmatprep.mubr.msk.f32.mxu0 %vm5108_vm2, %v5107_v48  ;;  %v4951_v23 = vpack.c.bf16 %v4032_v22, %v4031_v21 }
0x2179   :  { %v4738_v55 = vpop.f32.mrb[38].mxu0 }
0x217a   :  { %v3803_v60 = vadd.f32 %v4738_v55, %v4304_v54  ;;  %v3797_v14 = vpop.f32.mrb[39].mxu0 }
0x217b   :  { %v3798_v61 = vadd.f32 %v4304_v54, %v3797_v14 }
0x217c   :  { %v3807_v10 = vmul.f32 -1.702, %v3803_v60 }
0x217d   :  { %v3806_v63 = vmul.f32 -1.702, %v3798_v61 }
0x217e   :  { %v3810_v19 = vmul.f32 1.442695, %v3807_v10 }
0x217f   :  { %v3808_v59 = vmul.f32 1.442695, %v3806_v63 }
0x2180   :  { %5070 = vpow2.f32 %v3810_v19 }
0x2181   :  { %5072 = vpow2.f32 %v3808_v59 }
0x218a   :  { %v5071_v20 = vpop.eup %5070 }
0x218b   :  { %v5073_v1 = vpop.eup %5072  ;;  %v3813_v4 = vadd.f32 1.0, %v5071_v20 }
0x218c   :  { %v3812_v5 = vadd.f32 1.0, %v5073_v1 }
0x218d   :  { %5074 = vrcp.f32 %v3813_v4 }
0x218e   :  { %5076 = vrcp.f32 %v3812_v5 }
0x2197   :  { %v5075_v6 = vpop.eup %5074 }
0x2198   :  { %v5077_v51 = vpop.eup %5076  ;;  %v3819_v7 = vmul.f32 %v5075_v6, %v3803_v60 }
0x2199   :  { %v3818_v8 = vmul.f32 %v5077_v51, %v3798_v61 }
0x219b   :  { %4771 = vmatprep.mubr.f32.mxu1 %v3818_v8 }
0x219c   :  { %4772 = vmatmul.mubr.f32.vlgmr.msra.gmra.mrb[42].mxu1 %v3819_v7 }
0x226f   :  { %v4773_v11 = vpop.f32.mrb[42].mxu1 }
0x2270   :  { %v3917_v58 = vadd.f32 %v4773_v11, %v4324_v9  ;;  %v3911_v62 = vpop.f32.mrb[43].mxu1 }
0x2271   :  { %v3912_v13 = vadd.f32 %v4324_v9, %v3911_v62 }
0x2272   :  { %v3921_v15 = vadd.f32 %v3917_v58, %v5922_v52 }
0x2273   :  { %v3920_v16 = vadd.f32 %v3912_v13, %v5925_v37 }
0x2275   :  { %v4948_v17 = vpack.c.bf16 %v3921_v15, %v3920_v16 }
0x2277   :  { %4949 = vmatpush3.bf16.msra.mxu0 %v4948_v17 }
0x2278   :  { %4950 = vmatprep.subr.bf16.mxu0 %v5106_v3 }
0x227a   :  { %4779 = vmatmul.mubr.msk.f32.vlgmr.msra.gmra.mrb[40].mxu0 %vm1724_vm6, %v4325_v18 }
0x227b   :  { %4789 = vmatprep.mubr.msk.f32.mxu0 %vm5108_vm2, %v5107_v48  ;;  %4952 = vmatpush3.bf16.msra.mxu0 %v4951_v23 }
0x227c   :  { %4953 = vmatprep.subr.bf16.mxu0 %v5106_v3 }
0x227f   :  { %4955 = vmatpush3.bf16.msra.mxu0 %v4954_v26 }
0x2280   :  { %4956 = vmatprep.subr.bf16.mxu0 %v5106_v3 }
0x234d   :  { %v3997_v56 = vpop.f32.mrb[40].mxu0 }
0x234e   :  { %v4780_v53 = vpop.f32.mrb[41].mxu0  ;;  %v4004_v46 = vsel %vm4003_vm9, %v3997_v56, 0.0 }
0x234f   :  { %4005 = vadd.xlane.f32.xlu0 %v4004_v46 }
0x23dc   :  { %v4006_v52 = vpop.xlane.xlu0 %4005 }
0x23dd   :  { %v4007_v37 = vmul.f32 0.03125, %v4006_v52 }
0x23df   :  { %v4008_v31 = vsub.f32 %v3997_v56, %v4007_v37 }
0x23e1   :  { %v4009_v57 = vmul.f32 %v4008_v31, %v4008_v31 }
0x23e3   :  { %v4010_v0 = vsel %vm4003_vm9, %v4009_v57, 0.0 }
0x23e4   :  { %4011 = vadd.xlane.f32.xlu1 %v4010_v0 }
0x2471   :  { %v4012_v27 = vpop.xlane.xlu1 %4011 }
0x2472   :  { %v4013_v28 = vmul.f32 0.03125, %v4012_v27 }
0x2474   :  { %v4014_v30 = vadd.f32 1e-05, %v4013_v28 }
0x2476   :  { %5078 = vrsqrt.f32 %v4014_v30 }
0x2480   :  { %v5079_v32 = vpop.eup %5078 }
0x2481   :  { %v4016_v34 = vmul.f32 %v5079_v32, %v4008_v31 }
0x2483   :  { %v4023_v38 = vmul.f32 %v4327_v33, %v4016_v34 }
0x2485   :  { %v4030_v39 = vadd.f32 %v4328_v36, %v4023_v38 }
0x2487   :  { %4790 = vmatmul.mubr.msk.f32.vlgmr.msra.gmra.mrb[42].mxu0 %vm193_vm1, %v4030_v39 }
0x2488   :  { %4796 = vmatprep.mubr.msk.f32.mxu0 %vm5108_vm2, %v5107_v48  ;;  %4958 = vmatpush3.bf16.msra.mxu0 %v4957_v44 }
0x255a   :  { %v4104_v3 = vpop.f32.mrb[42].mxu0 }
0x255b   :  { %v4108_v40 = vmul.f32 %v4104_v3, %v4104_v3  ;;  %v4791_v41 = vpop.f32.mrb[43].mxu0 }
0x255d   :  { %v4110_v29 = vsel %vm4109_vm10, %v4108_v40, 0.0 }
0x255e   :  { %4111 = vadd.xlane.f32.xlu0 %v4110_v29 }
0x25eb   :  { %v4112_v35 = vpop.xlane.xlu0 %4111 }
0x25ec   :  { %5080 = vrsqrt.f32 %v4112_v35 }
0x25f6   :  { %v5081_v45 = vpop.eup %5080 }
0x25f7   :  { %v4114_v48 = vmul.f32 %v5081_v45, %v4104_v3 }
0x25f9   :  { %4797 = vmatmul.mubr.msk.f32.vlgmr.msra.gmra.mrb[44].mxu0 %vm1724_vm6, %v4114_v48 }
0x26cc   :  { %v4186_v49 = vpop.f32.mrb[44].mxu0 }
0x26cd   :  { %v4192_v50 = vmul.f32 %v4191_v47, %v4186_v49  ;;  %v4798_v54 = vpop.f32.mrb[45].mxu0 }
0x26cf   :  { %4194 = vst.msk [vmem:[#allocation3] sm:$0x3] %vm4193_vm11, %v4192_v50 }
0x26d0   :  { %5093 = shalt.err (!%p5090_p4)
}
0x26d1   :  { %s5094_s9 = scalar_lea.hbm %s6090_s24, 32 }
0x26d2   :  { %p5095_p5 = scmp.ne.s32.totalorder %s6090_s24, %s5094_s9  ;;  %p5098_p6 = scmp.lt.u32.totalorder %s5094_s9, %s6090_s24 }
0x26d4   :  { %p5100_p7 = pnand %p5098_p6, %p5095_p5 }
0x26d6   :  { %5103 = shalt.err (!%p5100_p7)
}
0x26d7   :  { %4204 = dma.vmem_to_hbm [thread:$0]  %s4202_s3, 32, %s6090_s24, [#allocation4]  }
0x26d8   :  { %5104 = dma.done.wait [#allocation4], 32  }
0x26d9   :  { %5105 = vsyncadd [#allocation4], 4294967264 }
0x26da   :  { %4208 = vsyncpa [#allocation4], 1 }

</bundles_post_ra>
